<compile_context>
chip_gen: v5e
topology: v5e:2x2
jax: 0.10.0
libtpu: 0.0.40
codegen_flags: <defaults>
</compile_context>

<pallas_src>
import functools
import math

import jax
import jax.numpy as jnp
from jax.experimental import pallas as pl
from jax.experimental.pallas import tpu as pltpu

_LANE = 128


def _round_up(n, m=_LANE):
    return ((n + m - 1) // m) * m


# ----------------------------------------------------------------------------
# Fused kernel
# ----------------------------------------------------------------------------
def _fused_decoder_kernel(layer_true_dims, x_ref, w0_ref, wstack_ref, bn_ref,
                          final_b_ref, o_ref):
    """[Linear -> BN -> LN -> ReLU] * n_layers -> Linear -> sigmoid, fused."""
    n_layers = len(layer_true_dims)
    batch = x_ref.shape[0]
    pad = wstack_ref.shape[-1]
    inv_batch = 1.0 / batch

    # Hoisted constants (JAX does not CSE broadcasts inside the unrolled loop).
    ones_row = jnp.ones((1, batch), jnp.float32)    # batch-axis reductions on MXU
    ones_feat = jnp.ones((pad, pad), jnp.float32)   # feature-axis reductions on MXU
    bn_all = bn_ref[...]                            # (2 * n_layers, pad) f32

    h = x_ref[...].astype(jnp.bfloat16)
    for i, true_dim in enumerate(layer_true_dims):
        w = w0_ref[...] if i == 0 else wstack_ref[i - 1]

        # Linear (bf16 operands, f32 accumulate).  The nn.Linear bias is omitted:
        # train-mode BatchNorm subtracts the batch mean right after, cancelling it.
        y = jnp.dot(h, w, preferred_element_type=jnp.float32)          # (batch, pad)

        # BatchNorm1d(eps=1e-3), train-mode batch stats (biased variance).
        # Both moments via MXU ones-matmuls (keeps the XLU off the serial path).
        y2 = y * y
        mu_b = jnp.dot(ones_row, y, preferred_element_type=jnp.float32) * inv_batch
        ex2_b = jnp.dot(ones_row, y2, preferred_element_type=jnp.float32) * inv_batch
        var_b = jnp.maximum(ex2_b - mu_b * mu_b, 0.0)
        gamma = bn_all[2 * i:2 * i + 1, :]
        beta = bn_all[2 * i + 1:2 * i + 2, :]
        y = (y - mu_b) * jax.lax.rsqrt(var_b + 1e-3) * gamma + beta

        # LayerNorm(eps=1e-5, no affine) over the TRUE feature count.  Padded
        # lanes are exactly 0 after BN (zero weight columns, beta_pad = 0), so
        # they add nothing to the MXU row sums.
        inv_feat = 1.0 / true_dim
        y2 = y * y
        mu_f = jnp.dot(y, ones_feat, preferred_element_type=jnp.float32) * inv_feat
        ex2_f = jnp.dot(y2, ones_feat, preferred_element_type=jnp.float32) * inv_feat
        var_f = jnp.maximum(ex2_f - mu_f * mu_f, 0.0)
        y = (y - mu_f) * jax.lax.rsqrt(var_f + 1e-5)

        # ReLU; Dropout(p=0) is the identity.  Padded lanes may be nonzero here
        # but the next weight's zero-padded rows make them inert.
        h = jnp.maximum(y, 0.0).astype(jnp.bfloat16)

    final_w = wstack_ref[n_layers - 1]
    out = jnp.dot(h, final_w, preferred_element_type=jnp.float32) + final_b_ref[...]
    o_ref[...] = jax.nn.sigmoid(out)


# ----------------------------------------------------------------------------
# Module builder: packed/padded params + jitted fused forward + pure-JAX reference
# ----------------------------------------------------------------------------
def build_fea_decoder(z_dim, hidden_dim, out_dim):
    dims = list(hidden_dim)[::-1]            # decoder hidden sizes (reversed)
    n_layers = len(dims)
    pad = max(_round_up(d) for d in dims + [out_dim])
    layer_true_dims = tuple(dims)

    kernel = functools.partial(_fused_decoder_kernel, layer_true_dims)
    vmem_spec = pl.BlockSpec(memory_space=pltpu.MemorySpace.VMEM)

    def init_params(key):
        """Deterministic synthetic params, lane-padded to `pad`, weights in bf16."""
        p = {}
        key, kw = jax.random.split(key)
        bound = 1.0 / math.sqrt(z_dim)
        w0 = jax.random.uniform(kw, (z_dim, dims[0]), jnp.float32, -bound, bound)
        p["w0"] = (jnp.zeros((z_dim, pad), jnp.float32)
                   .at[:, :dims[0]].set(w0).astype(jnp.bfloat16))

        stack = []
        in_dim = dims[0]
        for h_dim in dims[1:]:
            key, kw = jax.random.split(key)
            bound = 1.0 / math.sqrt(in_dim)
            w = jax.random.uniform(kw, (in_dim, h_dim), jnp.float32, -bound, bound)
            stack.append(jnp.zeros((pad, pad), jnp.float32).at[:in_dim, :h_dim].set(w))
            in_dim = h_dim
        key, kw, kb = jax.random.split(key, 3)
        bound = 1.0 / math.sqrt(in_dim)
        fw = jax.random.uniform(kw, (in_dim, out_dim), jnp.float32, -bound, bound)
        fb = jax.random.uniform(kb, (out_dim,), jnp.float32, -bound, bound)
        stack.append(jnp.zeros((pad, pad), jnp.float32).at[:in_dim, :out_dim].set(fw))
        p["w_stack"] = jnp.stack(stack).astype(jnp.bfloat16)     # (n_layers, pad, pad)
        p["final_b"] = jnp.zeros((1, pad), jnp.float32).at[0, :out_dim].set(fb)

        # BN gamma/beta stacked as rows [g0, b0, g1, b1, ...].  Padded beta lanes
        # MUST stay 0 so padded activations remain exactly 0 after BN.
        bn = jnp.zeros((2 * n_layers, pad), jnp.float32)
        for i, h_dim in enumerate(dims):
            key, kg, kbeta = jax.random.split(key, 3)
            g = jax.random.uniform(kg, (h_dim,), jnp.float32, 0.8, 1.2)
            b = jax.random.uniform(kbeta, (h_dim,), jnp.float32, -0.1, 0.1)
            bn = bn.at[2 * i, :h_dim].set(g)
            bn = bn.at[2 * i + 1, :h_dim].set(b)
        p["bn"] = bn
        return p

    @jax.jit
    def forward(params, z):
        batch = z.shape[0]
        flat = (z, params["w0"], params["w_stack"], params["bn"], params["final_b"])

        # Advisory cost hint so XLA can schedule/overlap this tiny custom call.
        bytes_accessed = sum(int(a.size) * a.dtype.itemsize for a in flat)
        bytes_accessed += batch * pad * 4                                  # output
        flops = 2 * batch * z_dim * pad                                    # first linear
        flops += 2 * batch * pad * pad * n_layers                          # other linears + final
        flops += n_layers * (2 * (2 * batch * pad) + 2 * (2 * batch * pad * pad))  # stat matmuls
        flops += n_layers * 12 * batch * pad                               # elementwise
        transcendentals = n_layers * (pad + batch * pad) + batch * pad     # rsqrt + sigmoid

        out = pl.pallas_call(
            kernel,
            out_shape=jax.ShapeDtypeStruct((batch, pad), jnp.float32),
            in_specs=[vmem_spec] * len(flat),
            out_specs=vmem_spec,
            compiler_params=pltpu.CompilerParams(
                vmem_limit_bytes=32 * 1024 * 1024),
            cost_estimate=pl.CostEstimate(
                flops=int(flops),
                transcendentals=int(transcendentals),
                bytes_accessed=int(bytes_accessed)),
        )(*flat)
        # Lane-padded (batch, pad) output; consumer slices [:, :out_dim].
        return out

    @jax.jit
    def reference(params, z):
        """Pure-JAX reference of the original PyTorch forward (train-mode BN)."""
        w_stack = params["w_stack"].astype(jnp.float32)
        h = z
        in_dim = z_dim
        for i, h_dim in enumerate(dims):
            if i == 0:
                w = params["w0"].astype(jnp.float32)[:, :h_dim]
            else:
                w = w_stack[i - 1][:in_dim, :h_dim]
            y = h @ w
            mu = jnp.mean(y, axis=0, keepdims=True)
            var = jnp.mean((y - mu) ** 2, axis=0, keepdims=True)
            g = params["bn"][2 * i, :h_dim]
            b = params["bn"][2 * i + 1, :h_dim]
            y = (y - mu) / jnp.sqrt(var + 1e-3) * g + b
            mu_f = jnp.mean(y, axis=-1, keepdims=True)
            var_f = jnp.mean((y - mu_f) ** 2, axis=-1, keepdims=True)
            y = (y - mu_f) / jnp.sqrt(var_f + 1e-5)
            h = jnp.maximum(y, 0.0)
            in_dim = h_dim
        fw = w_stack[n_layers - 1][:in_dim, :out_dim]
        fb = params["final_b"][0, :out_dim]
        return jax.nn.sigmoid(h @ fw + fb)

    return init_params, forward, reference


# ----------------------------------------------------------------------------
# Main
# ----------------------------------------------------------------------------
if __name__ == "__main__":
    # Small model dims consistent with the module; batch=128 so every matmul
    # feeds full MXU rows (perf review item #1).
    batch, z_dim, hidden_dim, out_dim = 128, 16, [64, 32], 48

    init_params, forward, reference = build_fea_decoder(z_dim, hidden_dim, out_dim)

    key = jax.random.PRNGKey(0)
    key_p, key_z = jax.random.split(key)
    params = init_params(key_p)
    z = jax.random.normal(key_z, (batch, z_dim), dtype=jnp.float32)

    out_padded = forward(params, z)
    jax.block_until_ready(out_padded)
    xrec = out_padded[:, :out_dim]       # consumer-side slice of the padded output

    assert xrec.shape == (batch, out_dim)
    assert bool(jnp.all((xrec >= 0.0) & (xrec <= 1.0)))

    ref = reference(params, z)
    max_err = float(jnp.max(jnp.abs(xrec - ref)))
    # bf16 matmul operands in the kernel (per perf review) -> tolerance loosened
    # from 1e-4 to 2e-2 against the f32 reference.
    assert max_err < 2e-2, f"mismatch vs reference: max abs err {max_err}"

    print("KERNEL_OK")
</pallas_src>

<mosaic_0001>
module attributes {stable_mosaic.version = 11 : i64} {
  func.func @_fused_decoder_kernel(%arg0: memref<128x16xf32, #tpu.memory_space<vmem>>, %arg1: memref<16x128xbf16, #tpu.memory_space<vmem>>, %arg2: memref<2x128x128xbf16, #tpu.memory_space<vmem>>, %arg3: memref<4x128xf32, #tpu.memory_space<vmem>>, %arg4: memref<1x128xf32, #tpu.memory_space<vmem>>, %arg5: memref<128x128xf32, #tpu.memory_space<vmem>>) attributes {dimension_semantics = [], scalar_prefetch = 0 : i64, scratch_operands = 0 : i64, tpu.core_type = #tpu.core_type<tc>} {
    %cst = arith.constant 1.000000e+00 : f32
    %0 = vector.broadcast %cst : f32 to vector<1x128xf32>
    %cst_0 = arith.constant 1.000000e+00 : f32
    %1 = vector.broadcast %cst_0 : f32 to vector<128x128xf32>
    %c0 = arith.constant 0 : index
    %c0_1 = arith.constant 0 : index
    %2 = vector.load %arg3[%c0, %c0_1] : memref<4x128xf32, #tpu.memory_space<vmem>>, vector<4x128xf32>
    %c0_2 = arith.constant 0 : index
    %c0_3 = arith.constant 0 : index
    %3 = vector.load %arg0[%c0_2, %c0_3] : memref<128x16xf32, #tpu.memory_space<vmem>>, vector<128x16xf32>
    %4 = arith.truncf %3 : vector<128x16xf32> to vector<128x16xbf16>
    %c0_4 = arith.constant 0 : index
    %c0_5 = arith.constant 0 : index
    %5 = vector.load %arg1[%c0_4, %c0_5] : memref<16x128xbf16, #tpu.memory_space<vmem>>, vector<16x128xbf16>
    %cst_6 = arith.constant dense<0.000000e+00> : vector<128x128xf32>
    %6 = tpu.matmul %4, %5, %cst_6 {dimension_numbers = #tpu.dot_dimension_numbers<[1], [0], [0], [1], [0, 0, 1, 1], [], []>} : vector<128x16xbf16>, vector<16x128xbf16>, vector<128x128xf32> -> vector<128x128xf32>
    %7 = arith.mulf %6, %6 : vector<128x128xf32>
    %cst_7 = arith.constant dense<0.000000e+00> : vector<1x128xf32>
    %8 = tpu.matmul %0, %6, %cst_7 {dimension_numbers = #tpu.dot_dimension_numbers<[1], [0], [0], [1], [0, 0, 1, 1], [], []>} : vector<1x128xf32>, vector<128x128xf32>, vector<1x128xf32> -> vector<1x128xf32>
    %cst_8 = arith.constant 7.812500e-03 : f32
    %9 = vector.broadcast %cst_8 : f32 to vector<1x128xf32>
    %10 = arith.mulf %8, %9 : vector<1x128xf32>
    %cst_9 = arith.constant dense<0.000000e+00> : vector<1x128xf32>
    %11 = tpu.matmul %0, %7, %cst_9 {dimension_numbers = #tpu.dot_dimension_numbers<[1], [0], [0], [1], [0, 0, 1, 1], [], []>} : vector<1x128xf32>, vector<128x128xf32>, vector<1x128xf32> -> vector<1x128xf32>
    %cst_10 = arith.constant 7.812500e-03 : f32
    %12 = vector.broadcast %cst_10 : f32 to vector<1x128xf32>
    %13 = arith.mulf %11, %12 : vector<1x128xf32>
    %14 = arith.mulf %10, %10 : vector<1x128xf32>
    %15 = arith.subf %13, %14 : vector<1x128xf32>
    %cst_11 = arith.constant 0.000000e+00 : f32
    %16 = vector.broadcast %cst_11 : f32 to vector<1x128xf32>
    %17 = arith.maximumf %15, %16 : vector<1x128xf32>
    %18 = vector.extract_strided_slice %2 {offsets = [0, 0], sizes = [1, 128], strides = [1, 1]} : vector<4x128xf32> to vector<1x128xf32>
    %19 = vector.extract_strided_slice %2 {offsets = [1, 0], sizes = [1, 128], strides = [1, 1]} : vector<4x128xf32> to vector<1x128xf32>
    %20 = vector.broadcast %10 : vector<1x128xf32> to vector<128x128xf32>
    %21 = arith.subf %6, %20 : vector<128x128xf32>
    %cst_12 = arith.constant 1.000000e-03 : f32
    %22 = vector.broadcast %cst_12 : f32 to vector<1x128xf32>
    %23 = arith.addf %17, %22 : vector<1x128xf32>
    %24 = math.rsqrt %23 : vector<1x128xf32>
    %25 = vector.broadcast %24 : vector<1x128xf32> to vector<128x128xf32>
    %26 = arith.mulf %21, %25 : vector<128x128xf32>
    %27 = vector.broadcast %18 : vector<1x128xf32> to vector<128x128xf32>
    %28 = arith.mulf %26, %27 : vector<128x128xf32>
    %29 = vector.broadcast %19 : vector<1x128xf32> to vector<128x128xf32>
    %30 = arith.addf %28, %29 : vector<128x128xf32>
    %31 = arith.mulf %30, %30 : vector<128x128xf32>
    %cst_13 = arith.constant dense<0.000000e+00> : vector<128x128xf32>
    %32 = tpu.matmul %30, %1, %cst_13 {dimension_numbers = #tpu.dot_dimension_numbers<[1], [0], [0], [1], [0, 0, 1, 1], [], []>} : vector<128x128xf32>, vector<128x128xf32>, vector<128x128xf32> -> vector<128x128xf32>
    %cst_14 = arith.constant 3.125000e-02 : f32
    %33 = vector.broadcast %cst_14 : f32 to vector<128x128xf32>
    %34 = arith.mulf %32, %33 : vector<128x128xf32>
    %cst_15 = arith.constant dense<0.000000e+00> : vector<128x128xf32>
    %35 = tpu.matmul %31, %1, %cst_15 {dimension_numbers = #tpu.dot_dimension_numbers<[1], [0], [0], [1], [0, 0, 1, 1], [], []>} : vector<128x128xf32>, vector<128x128xf32>, vector<128x128xf32> -> vector<128x128xf32>
    %cst_16 = arith.constant 3.125000e-02 : f32
    %36 = vector.broadcast %cst_16 : f32 to vector<128x128xf32>
    %37 = arith.mulf %35, %36 : vector<128x128xf32>
    %38 = arith.mulf %34, %34 : vector<128x128xf32>
    %39 = arith.subf %37, %38 : vector<128x128xf32>
    %cst_17 = arith.constant 0.000000e+00 : f32
    %40 = vector.broadcast %cst_17 : f32 to vector<128x128xf32>
    %41 = arith.maximumf %39, %40 : vector<128x128xf32>
    %42 = arith.subf %30, %34 : vector<128x128xf32>
    %cst_18 = arith.constant 9.99999974E-6 : f32
    %43 = vector.broadcast %cst_18 : f32 to vector<128x128xf32>
    %44 = arith.addf %41, %43 : vector<128x128xf32>
    %45 = math.rsqrt %44 : vector<128x128xf32>
    %46 = arith.mulf %42, %45 : vector<128x128xf32>
    %cst_19 = arith.constant 0.000000e+00 : f32
    %47 = vector.broadcast %cst_19 : f32 to vector<128x128xf32>
    %48 = arith.maximumf %46, %47 : vector<128x128xf32>
    %49 = arith.truncf %48 : vector<128x128xf32> to vector<128x128xbf16>
    %c0_20 = arith.constant 0 : index
    %c0_21 = arith.constant 0 : index
    %c0_22 = arith.constant 0 : index
    %50 = vector.load %arg2[%c0_20, %c0_21, %c0_22] : memref<2x128x128xbf16, #tpu.memory_space<vmem>>, vector<1x128x128xbf16>
    %51 = vector.shape_cast %50 : vector<1x128x128xbf16> to vector<128x128xbf16>
    %cst_23 = arith.constant dense<0.000000e+00> : vector<128x128xf32>
    %52 = tpu.matmul %49, %51, %cst_23 {dimension_numbers = #tpu.dot_dimension_numbers<[1], [0], [0], [1], [0, 0, 1, 1], [], []>} : vector<128x128xbf16>, vector<128x128xbf16>, vector<128x128xf32> -> vector<128x128xf32>
    %53 = arith.mulf %52, %52 : vector<128x128xf32>
    %cst_24 = arith.constant dense<0.000000e+00> : vector<1x128xf32>
    %54 = tpu.matmul %0, %52, %cst_24 {dimension_numbers = #tpu.dot_dimension_numbers<[1], [0], [0], [1], [0, 0, 1, 1], [], []>} : vector<1x128xf32>, vector<128x128xf32>, vector<1x128xf32> -> vector<1x128xf32>
    %cst_25 = arith.constant 7.812500e-03 : f32
    %55 = vector.broadcast %cst_25 : f32 to vector<1x128xf32>
    %56 = arith.mulf %54, %55 : vector<1x128xf32>
    %cst_26 = arith.constant dense<0.000000e+00> : vector<1x128xf32>
    %57 = tpu.matmul %0, %53, %cst_26 {dimension_numbers = #tpu.dot_dimension_numbers<[1], [0], [0], [1], [0, 0, 1, 1], [], []>} : vector<1x128xf32>, vector<128x128xf32>, vector<1x128xf32> -> vector<1x128xf32>
    %cst_27 = arith.constant 7.812500e-03 : f32
    %58 = vector.broadcast %cst_27 : f32 to vector<1x128xf32>
    %59 = arith.mulf %57, %58 : vector<1x128xf32>
    %60 = arith.mulf %56, %56 : vector<1x128xf32>
    %61 = arith.subf %59, %60 : vector<1x128xf32>
    %cst_28 = arith.constant 0.000000e+00 : f32
    %62 = vector.broadcast %cst_28 : f32 to vector<1x128xf32>
    %63 = arith.maximumf %61, %62 : vector<1x128xf32>
    %64 = vector.extract_strided_slice %2 {offsets = [2, 0], sizes = [1, 128], strides = [1, 1]} : vector<4x128xf32> to vector<1x128xf32>
    %65 = vector.extract_strided_slice %2 {offsets = [3, 0], sizes = [1, 128], strides = [1, 1]} : vector<4x128xf32> to vector<1x128xf32>
    %66 = vector.broadcast %56 : vector<1x128xf32> to vector<128x128xf32>
    %67 = arith.subf %52, %66 : vector<128x128xf32>
    %cst_29 = arith.constant 1.000000e-03 : f32
    %68 = vector.broadcast %cst_29 : f32 to vector<1x128xf32>
    %69 = arith.addf %63, %68 : vector<1x128xf32>
    %70 = math.rsqrt %69 : vector<1x128xf32>
    %71 = vector.broadcast %70 : vector<1x128xf32> to vector<128x128xf32>
    %72 = arith.mulf %67, %71 : vector<128x128xf32>
    %73 = vector.broadcast %64 : vector<1x128xf32> to vector<128x128xf32>
    %74 = arith.mulf %72, %73 : vector<128x128xf32>
    %75 = vector.broadcast %65 : vector<1x128xf32> to vector<128x128xf32>
    %76 = arith.addf %74, %75 : vector<128x128xf32>
    %77 = arith.mulf %76, %76 : vector<128x128xf32>
    %cst_30 = arith.constant dense<0.000000e+00> : vector<128x128xf32>
    %78 = tpu.matmul %76, %1, %cst_30 {dimension_numbers = #tpu.dot_dimension_numbers<[1], [0], [0], [1], [0, 0, 1, 1], [], []>} : vector<128x128xf32>, vector<128x128xf32>, vector<128x128xf32> -> vector<128x128xf32>
    %cst_31 = arith.constant 1.562500e-02 : f32
    %79 = vector.broadcast %cst_31 : f32 to vector<128x128xf32>
    %80 = arith.mulf %78, %79 : vector<128x128xf32>
    %cst_32 = arith.constant dense<0.000000e+00> : vector<128x128xf32>
    %81 = tpu.matmul %77, %1, %cst_32 {dimension_numbers = #tpu.dot_dimension_numbers<[1], [0], [0], [1], [0, 0, 1, 1], [], []>} : vector<128x128xf32>, vector<128x128xf32>, vector<128x128xf32> -> vector<128x128xf32>
    %cst_33 = arith.constant 1.562500e-02 : f32
    %82 = vector.broadcast %cst_33 : f32 to vector<128x128xf32>
    %83 = arith.mulf %81, %82 : vector<128x128xf32>
    %84 = arith.mulf %80, %80 : vector<128x128xf32>
    %85 = arith.subf %83, %84 : vector<128x128xf32>
    %cst_34 = arith.constant 0.000000e+00 : f32
    %86 = vector.broadcast %cst_34 : f32 to vector<128x128xf32>
    %87 = arith.maximumf %85, %86 : vector<128x128xf32>
    %88 = arith.subf %76, %80 : vector<128x128xf32>
    %cst_35 = arith.constant 9.99999974E-6 : f32
    %89 = vector.broadcast %cst_35 : f32 to vector<128x128xf32>
    %90 = arith.addf %87, %89 : vector<128x128xf32>
    %91 = math.rsqrt %90 : vector<128x128xf32>
    %92 = arith.mulf %88, %91 : vector<128x128xf32>
    %cst_36 = arith.constant 0.000000e+00 : f32
    %93 = vector.broadcast %cst_36 : f32 to vector<128x128xf32>
    %94 = arith.maximumf %92, %93 : vector<128x128xf32>
    %95 = arith.truncf %94 : vector<128x128xf32> to vector<128x128xbf16>
    %c1 = arith.constant 1 : index
    %c0_37 = arith.constant 0 : index
    %c0_38 = arith.constant 0 : index
    %96 = vector.load %arg2[%c1, %c0_37, %c0_38] : memref<2x128x128xbf16, #tpu.memory_space<vmem>>, vector<1x128x128xbf16>
    %97 = vector.shape_cast %96 : vector<1x128x128xbf16> to vector<128x128xbf16>
    %cst_39 = arith.constant dense<0.000000e+00> : vector<128x128xf32>
    %98 = tpu.matmul %95, %97, %cst_39 {dimension_numbers = #tpu.dot_dimension_numbers<[1], [0], [0], [1], [0, 0, 1, 1], [], []>} : vector<128x128xbf16>, vector<128x128xbf16>, vector<128x128xf32> -> vector<128x128xf32>
    %c0_40 = arith.constant 0 : index
    %c0_41 = arith.constant 0 : index
    %99 = vector.load %arg4[%c0_40, %c0_41] : memref<1x128xf32, #tpu.memory_space<vmem>>, vector<1x128xf32>
    %100 = vector.broadcast %99 : vector<1x128xf32> to vector<128x128xf32>
    %101 = arith.addf %98, %100 : vector<128x128xf32>
    %102 = arith.negf %101 : vector<128x128xf32>
    %103 = math.exp %102 : vector<128x128xf32>
    %cst_42 = arith.constant 1.000000e+00 : f32
    %104 = vector.broadcast %cst_42 : f32 to vector<128x128xf32>
    %105 = arith.addf %104, %103 : vector<128x128xf32>
    %106 = arith.divf %104, %105 : vector<128x128xf32>
    %c0_43 = arith.constant 0 : index
    %c0_44 = arith.constant 0 : index
    %107 = vector.load %arg5[%c0_43, %c0_44] : memref<128x128xf32, #tpu.memory_space<vmem>>, vector<128x128xf32>
    tpu.vector_store %arg5[%c0_43, %c0_44], %106 {strides = array<i32>} : memref<128x128xf32, #tpu.memory_space<vmem>>, vector<128x128xf32>,
    return
  }
}

</mosaic_0001>

<bundles_post_ra>
// kernel: forward.1
= control target key start
LH: loop header
LB: loop body
LE: loop exit
PB: predicated region body
PF: predicated region fallthrough
CT: control target
= control target key end

     0   :  { %vm55_vm0 = vcmask 130048   ;;  %s3319_s0 = inlined_call_operand.vmem [shape: f32[128,16], index: 0, kind: input, shape index: {}]   ;;  %s3320_s1 = inlined_call_operand.vmem [shape: bf16[16,128], index: 1, kind: input, shape index: {}]   ;;  %s3321_s2 = inlined_call_operand.vmem [shape: bf16[2,128,128], index: 2, kind: input, shape index: {}]   ;;  %s3322_s3 = inlined_call_operand.vmem [shape: f32[4,128], index: 3, kind: input, shape index: {}]   ;;  %s3323_s4 = inlined_call_operand.vmem [shape: f32[1,128], index: 4, kind: input, shape index: {}]   ;;  %s3324_s5 = inlined_call_operand.hbm [shape: f32[128,128], index: 5, kind: output, shape index: {}]  }
   0x1   :  { %v2002_v0 = vld [vmem:[%s3320_s1] sm:$0xff]  ;;  %v24_v2 = vld [vmem:[%s3319_s0 + $0x8] sm:$0xff] }
   0x2   :  { %v23_v1 = vld [vmem:[%s3319_s0] sm:$0xff]  ;;  %87 = vmatpush.bf16.msra.mxu0 %v2002_v0 }
   0x3   :  { %v39_v3 = vpack.c.bf16 %v24_v2, %v23_v1 }
   0x4   :  { %10 = vsyncpa [#allocation3], 0  ;;  %v25_v4 = vld [vmem:[%s3319_s0 + $0x10] sm:$0xff]  ;;  %v26_v5 = vld [vmem:[%s3319_s0 + $0x18] sm:$0xff]  ;;  %v2215_v41 = vmov 1.0   ;;  %s1882_s11 = sshll.u32 %s3324_s5, 4  ;;  %s1883_s11 = int_to_ptr.hbm [resolvable:$true] %s1882_s11 }
   0x5   :  { %1898 = vmatmul.msk.bf16.vlgmr.msra.gmra.mxu0 %vm55_vm0, %v39_v3  ;;  %v40_v6 = vpack.c.bf16 %v26_v5, %v25_v4  ;;  %v27_v7 = vld [vmem:[%s3319_s0 + $0x20] sm:$0xff]  ;;  %v28_v8 = vld [vmem:[%s3319_s0 + $0x28] sm:$0xff]  ;;  %v29_v10 = vld [vmem:[%s3319_s0 + $0x30] sm:$0xff]  ;;  %285 = vmatpush.msra.mxu3 %v2215_v41  ;;  %s2217_s12 = smov 128   ;;  %s2218_s13 = smov 8  }
   0x6   :  { %v41_v9 = vpack.c.bf16 %v28_v8, %v27_v7  ;;  %v30_v11 = vld [vmem:[%s3319_s0 + $0x38] sm:$0xff]  ;;  %v31_v13 = vld [vmem:[%s3319_s0 + $0x40] sm:$0xff]  ;;  %v32_v14 = vld [vmem:[%s3319_s0 + $0x48] sm:$0xff]  ;;  %996 = vmatpush.msrb.mxu0 %v2215_v41 }
   0x7   :  { %v42_v12 = vpack.c.bf16 %v30_v11, %v29_v10  ;;  %v43_v15 = vpack.c.bf16 %v32_v14, %v31_v13  ;;  %v33_v16 = vld [vmem:[%s3319_s0 + $0x50] sm:$0xff]  ;;  %v34_v17 = vld [vmem:[%s3319_s0 + $0x58] sm:$0xff]  ;;  %v35_v19 = vld [vmem:[%s3319_s0 + $0x60] sm:$0xff]  ;;  %286 = vmatpush.msra.mxu3 %v2215_v41 }
   0x8   :  { %v44_v18 = vpack.c.bf16 %v34_v17, %v33_v16  ;;  %v36_v20 = vld [vmem:[%s3319_s0 + $0x68] sm:$0xff]  ;;  %v37_v22 = vld [vmem:[%s3319_s0 + $0x70] sm:$0xff]  ;;  %v38_v23 = vld [vmem:[%s3319_s0 + $0x78] sm:$0xff]  ;;  %997 = vmatpush.msrb.mxu0 %v2215_v41 }
   0x9   :  { %v45_v21 = vpack.c.bf16 %v36_v20, %v35_v19  ;;  %v46_v24 = vpack.c.bf16 %v38_v23, %v37_v22  ;;  %287 = vmatpush.msra.mxu3 %v2215_v41 }
   0xa   :  { %998 = vmatpush.msrb.mxu0 %v2215_v41 }
   0xb   :  { %288 = vmatpush.msra.mxu3 %v2215_v41 }
   0xc   :  { %999 = vmatpush.msrb.mxu0 %v2215_v41 }
   0xd   :  { %289 = vmatpush.msra.mxu3 %v2215_v41 }
   0xe   :  { %1000 = vmatpush.msrb.mxu0 %v2215_v41 }
   0xf   :  { %290 = vmatpush.msra.mxu3 %v2215_v41 }
  0x10   :  { %1001 = vmatpush.msrb.mxu0 %v2215_v41 }
  0x11   :  { %291 = vmatpush.msra.mxu3 %v2215_v41 }
  0x12   :  { %1002 = vmatpush.msrb.mxu0 %v2215_v41 }
  0x13   :  { %292 = vmatpush.msra.mxu3 %v2215_v41 }
  0x14   :  { %1003 = vmatpush.msrb.mxu0 %v2215_v41 }
  0x15   :  { %1899 = vmatmul.msk.bf16.gmra.mxu0 %vm55_vm0, %v40_v6  ;;  %293 = vmatpush.msra.mxu3 %v2215_v41 }
  0x16   :  { %1004 = vmatpush.msrb.mxu0 %v2215_v41 }
  0x17   :  { %294 = vmatpush.msra.mxu3 %v2215_v41 }
  0x18   :  { %1005 = vmatpush.msrb.mxu0 %v2215_v41 }
  0x19   :  { %295 = vmatpush.msra.mxu3 %v2215_v41 }
  0x1a   :  { %1006 = vmatpush.msrb.mxu0 %v2215_v41 }
  0x1b   :  { %296 = vmatpush.msra.mxu3 %v2215_v41 }
  0x1c   :  { %1007 = vmatpush.msrb.mxu0 %v2215_v41 }
  0x1d   :  { %297 = vmatpush.msra.mxu3 %v2215_v41 }
  0x1e   :  { %1008 = vmatpush.msrb.mxu0 %v2215_v41 }
  0x1f   :  { %298 = vmatpush.msra.mxu3 %v2215_v41 }
  0x20   :  { %1009 = vmatpush.msrb.mxu0 %v2215_v41 }
  0x21   :  { %299 = vmatpush.msra.mxu3 %v2215_v41 }
  0x22   :  { %1010 = vmatpush.msrb.mxu0 %v2215_v41 }
  0x23   :  { %300 = vmatpush.msra.mxu3 %v2215_v41 }
  0x24   :  { %1011 = vmatpush.msrb.mxu0 %v2215_v41 }
  0x25   :  { %1900 = vmatmul.msk.bf16.gmra.mxu0 %vm55_vm0, %v41_v9  ;;  %2019 = vmatpush.msrb.mxu3 %v2215_v41  ;;  %v22_v9 = vld [vmem:[%s3322_s3] sm:$0xf] }
  0x26   :  { %1077 = vmatpush.msra.mxu0 %v2215_v41  ;;  %v2479_v13 = vperm.slane %v22_v9, 0  ;;  %v2484_v16 = vperm.slane %v22_v9, 1 }
  0x27   :  { %2020 = vmatpush.msrb.mxu3 %v2215_v41 }
  0x28   :  { %1078 = vmatpush.msra.mxu0 %v2215_v41 }
  0x29   :  { %2021 = vmatpush.msrb.mxu3 %v2215_v41 }
  0x2a   :  { %1079 = vmatpush.msra.mxu0 %v2215_v41 }
  0x2b   :  { %2022 = vmatpush.msrb.mxu3 %v2215_v41 }
  0x2c   :  { %1080 = vmatpush.msra.mxu0 %v2215_v41 }
  0x2d   :  { %2023 = vmatpush.msrb.mxu3 %v2215_v41 }
  0x2e   :  { %1081 = vmatpush.msra.mxu0 %v2215_v41 }
  0x2f   :  { %2024 = vmatpush.msrb.mxu3 %v2215_v41 }
  0x30   :  { %1082 = vmatpush.msra.mxu0 %v2215_v41 }
  0x31   :  { %2025 = vmatpush.msrb.mxu3 %v2215_v41 }
  0x32   :  { %1083 = vmatpush.msra.mxu0 %v2215_v41 }
  0x33   :  { %2026 = vmatpush.msrb.mxu3 %v2215_v41 }
  0x34   :  { %1084 = vmatpush.msra.mxu0 %v2215_v41 }
  0x35   :  { %1901 = vmatmul.msk.bf16.gmra.mxu0 %vm55_vm0, %v42_v12  ;;  %2027 = vmatpush.msrb.mxu3 %v2215_v41 }
  0x36   :  { %1085 = vmatpush.msra.mxu0 %v2215_v41 }
  0x37   :  { %2028 = vmatpush.msrb.mxu3 %v2215_v41 }
  0x38   :  { %1086 = vmatpush.msra.mxu0 %v2215_v41 }
  0x39   :  { %2029 = vmatpush.msrb.mxu3 %v2215_v41 }
  0x3a   :  { %1087 = vmatpush.msra.mxu0 %v2215_v41 }
  0x3b   :  { %2030 = vmatpush.msrb.mxu3 %v2215_v41 }
  0x3c   :  { %1088 = vmatpush.msra.mxu0 %v2215_v41 }
  0x3d   :  { %2031 = vmatpush.msrb.mxu3 %v2215_v41 }
  0x3e   :  { %1089 = vmatpush.msra.mxu0 %v2215_v41 }
  0x3f   :  { %2032 = vmatpush.msrb.mxu3 %v2215_v41 }
  0x40   :  { %1090 = vmatpush.msra.mxu0 %v2215_v41 }
  0x41   :  { %2033 = vmatpush.msrb.mxu3 %v2215_v41 }
  0x42   :  { %1091 = vmatpush.msra.mxu0 %v2215_v41 }
  0x43   :  { %2034 = vmatpush.msrb.mxu3 %v2215_v41 }
  0x44   :  { %1092 = vmatpush.msra.mxu0 %v2215_v41 }
  0x45   :  { %1902 = vmatmul.msk.bf16.gmra.mxu0 %vm55_vm0, %v43_v15 }
  0x55   :  { %1903 = vmatmul.msk.bf16.gmra.mxu0 %vm55_vm0, %v44_v18 }
  0x65   :  { %1904 = vmatmul.msk.bf16.gmra.mxu0 %vm55_vm0, %v45_v21 }
  0x75   :  { %1905 = vmatmul.msk.bf16.gmra.mxu0 %vm55_vm0, %v46_v24 }
  0x82   :  { %v2308_v25 = vpop.f32.mrf.mxu0 }
  0x83   :  { %v129_v57 = vmul.f32 %v2308_v25, %v2308_v25 }
  0x8a   :  { %v2310_v26 = vpop.f32.mrf.mxu0 }
  0x8b   :  { %v130_v56 = vmul.f32 %v2310_v26, %v2310_v26 }
  0x92   :  { %v2312_v27 = vpop.f32.mrf.mxu0 }
  0x93   :  { %v131_v55 = vmul.f32 %v2312_v27, %v2312_v27 }
  0x9a   :  { %v2314_v28 = vpop.f32.mrf.mxu0 }
  0x9b   :  { %v132_v54 = vmul.f32 %v2314_v28, %v2314_v28 }
  0xa2   :  { %v2316_v29 = vpop.f32.mrf.mxu0 }
  0xa3   :  { %v133_v53 = vmul.f32 %v2316_v29, %v2316_v29 }
  0xaa   :  { %v2318_v30 = vpop.f32.mrf.mxu0 }
  0xab   :  { %v134_v52 = vmul.f32 %v2318_v30, %v2318_v30 }
  0xb2   :  { %v2320_v31 = vpop.f32.mrf.mxu0 }
  0xb3   :  { %v135_v51 = vmul.f32 %v2320_v31, %v2320_v31 }
  0xba   :  { %v2322_v32 = vpop.f32.mrf.mxu0 }
  0xbb   :  { %v136_v50 = vmul.f32 %v2322_v32, %v2322_v32 }
  0xc2   :  { %v2324_v33 = vpop.f32.mrf.mxu0 }
  0xc3   :  { %v137_v49 = vmul.f32 %v2324_v33, %v2324_v33 }
  0xca   :  { %v2326_v34 = vpop.f32.mrf.mxu0 }
  0xcb   :  { %v138_v48 = vmul.f32 %v2326_v34, %v2326_v34 }
  0xd2   :  { %v2328_v35 = vpop.f32.mrf.mxu0 }
  0xd3   :  { %v139_v47 = vmul.f32 %v2328_v35, %v2328_v35 }
  0xda   :  { %v2330_v36 = vpop.f32.mrf.mxu0 }
  0xdb   :  { %v140_v46 = vmul.f32 %v2330_v36, %v2330_v36 }
  0xe2   :  { %v2332_v37 = vpop.f32.mrf.mxu0 }
  0xe3   :  { %v141_v45 = vmul.f32 %v2332_v37, %v2332_v37 }
  0xea   :  { %v2334_v38 = vpop.f32.mrf.mxu0 }
  0xeb   :  { %v142_v44 = vmul.f32 %v2334_v38, %v2334_v38 }
  0xf2   :  { %v2336_v39 = vpop.f32.mrf.mxu0 }
  0xf3   :  { %v143_v43 = vmul.f32 %v2336_v39, %v2336_v39 }
  0xfa   :  { %v2338_v40 = vpop.f32.mrf.mxu0 }
  0xfb   :  { %145 = vmatpush.msra.mxu1 %v2338_v40  ;;  %v144_v42 = vmul.f32 %v2338_v40, %v2338_v40 }
  0xfd   :  { %146 = vmatpush.msra.mxu1 %v2336_v39 }
  0xff   :  { %147 = vmatpush.msra.mxu1 %v2334_v38 }
 0x101   :  { %148 = vmatpush.msra.mxu1 %v2332_v37 }
 0x103   :  { %149 = vmatpush.msra.mxu1 %v2330_v36 }
 0x105   :  { %150 = vmatpush.msra.mxu1 %v2328_v35 }
 0x107   :  { %151 = vmatpush.msra.mxu1 %v2326_v34 }
 0x109   :  { %152 = vmatpush.msra.mxu1 %v2324_v33 }
 0x10b   :  { %153 = vmatpush.msra.mxu1 %v2322_v32 }
 0x10d   :  { %154 = vmatpush.msra.mxu1 %v2320_v31 }
 0x10f   :  { %155 = vmatpush.msra.mxu1 %v2318_v30 }
 0x111   :  { %156 = vmatpush.msra.mxu1 %v2316_v29 }
 0x113   :  { %157 = vmatpush.msra.mxu1 %v2314_v28 }
 0x115   :  { %158 = vmatpush.msra.mxu1 %v2312_v27 }
 0x117   :  { %159 = vmatpush.msra.mxu1 %v2310_v26 }
 0x119   :  { %160 = vmatpush.msra.mxu1 %v2308_v25 }
 0x11a   :  { %161 = vmatmul.f32.vlgmr.msra.gmra.mxu1 %v2215_v41 }
 0x11b   :  { %166 = vmatpush.msrb.mxu1 %v144_v42 }
 0x11d   :  { %167 = vmatpush.msrb.mxu1 %v143_v43 }
 0x11f   :  { %168 = vmatpush.msrb.mxu1 %v142_v44 }
 0x121   :  { %169 = vmatpush.msrb.mxu1 %v141_v45 }
 0x123   :  { %170 = vmatpush.msrb.mxu1 %v140_v46 }
 0x125   :  { %171 = vmatpush.msrb.mxu1 %v139_v47 }
 0x127   :  { %172 = vmatpush.msrb.mxu1 %v138_v48 }
 0x129   :  { %173 = vmatpush.msrb.mxu1 %v137_v49 }
 0x12b   :  { %174 = vmatpush.msrb.mxu1 %v136_v50 }
 0x12d   :  { %175 = vmatpush.msrb.mxu1 %v135_v51 }
 0x12f   :  { %176 = vmatpush.msrb.mxu1 %v134_v52 }
 0x131   :  { %177 = vmatpush.msrb.mxu1 %v133_v53 }
 0x133   :  { %178 = vmatpush.msrb.mxu1 %v132_v54 }
 0x135   :  { %179 = vmatpush.msrb.mxu1 %v131_v55 }
 0x137   :  { %180 = vmatpush.msrb.mxu1 %v130_v56 }
 0x139   :  { %181 = vmatpush.msrb.mxu1 %v129_v57 }
 0x13a   :  { %182 = vmatmul.f32.vlgmr.msrb.gmra.mxu1 %v2215_v41 }
 0x13b   :  { %366 = vmatpush.msra.mxu1 %v2215_v41 }
 0x13d   :  { %367 = vmatpush.msra.mxu1 %v2215_v41 }
 0x13f   :  { %368 = vmatpush.msra.mxu1 %v2215_v41 }
 0x141   :  { %369 = vmatpush.msra.mxu1 %v2215_v41 }
 0x143   :  { %370 = vmatpush.msra.mxu1 %v2215_v41 }
 0x145   :  { %371 = vmatpush.msra.mxu1 %v2215_v41 }
 0x147   :  { %372 = vmatpush.msra.mxu1 %v2215_v41 }
 0x149   :  { %373 = vmatpush.msra.mxu1 %v2215_v41 }
 0x14b   :  { %374 = vmatpush.msra.mxu1 %v2215_v41 }
 0x14d   :  { %375 = vmatpush.msra.mxu1 %v2215_v41 }
 0x14f   :  { %376 = vmatpush.msra.mxu1 %v2215_v41 }
 0x151   :  { %377 = vmatpush.msra.mxu1 %v2215_v41 }
 0x153   :  { %378 = vmatpush.msra.mxu1 %v2215_v41 }
 0x155   :  { %379 = vmatpush.msra.mxu1 %v2215_v41 }
 0x157   :  { %380 = vmatpush.msra.mxu1 %v2215_v41 }
 0x159   :  { %381 = vmatpush.msra.mxu1 %v2215_v41 }
 0x197   :  { %v162_v58 = vpop.f32.mrf.mxu1 }
 0x198   :  { %v165_v59 = vmul.f32 0.0078125, %v162_v58 }
 0x19a   :  { %v187_v61 = vmul.f32 %v165_v59, %v165_v59  ;;  %v2470_v7 = vperm.slane %v165_v59, 0 }
 0x19c   :  { %v191_v12 = vsub.f32 %v2308_v25, %v2470_v7  ;;  %v192_v14 = vsub.f32 %v2310_v26, %v2470_v7  ;;  %v193_v20 = vsub.f32 %v2312_v27, %v2470_v7  ;;  %v199_v22 = vsub.f32 %v2324_v33, %v2470_v7 }
 0x19d   :  { %v200_v23 = vsub.f32 %v2326_v34, %v2470_v7  ;;  %v201_v24 = vsub.f32 %v2328_v35, %v2470_v7  ;;  %v202_v25 = vsub.f32 %v2330_v36, %v2470_v7  ;;  %v203_v26 = vsub.f32 %v2332_v37, %v2470_v7 }
 0x19e   :  { %v204_v27 = vsub.f32 %v2334_v38, %v2470_v7  ;;  %v205_v42 = vsub.f32 %v2336_v39, %v2470_v7  ;;  %v206_v36 = vsub.f32 %v2338_v40, %v2470_v7 }
 0x1b7   :  { %v183_v60 = vpop.f32.mrf.mxu1 }
 0x1b8   :  { %v186_v62 = vmul.f32 0.0078125, %v183_v60 }
 0x1ba   :  { %v188_v63 = vsub.f32 %v186_v62, %v187_v61 }
 0x1bc   :  { %v189_v0 = vmax.f32 %v188_v63, 0.0 }
 0x1be   :  { %v207_v1 = vadd.f32 0.001, %v189_v0 }
 0x1c0   :  { %2056 = vrsqrt.f32 %v207_v1  ;;  %vm214_vm2 = vweird.f32 %v207_v1 }
 0x1c6   :  { %v2057_v2 = vpop.eup %2056 }
 0x1c7   :  { %v209_v3 = vmul.f32 %v2057_v2, %v207_v1  ;;  %vm215_vm1 = vweird.f32 %v2057_v2  ;;  %v194_v1 = vsub.f32 %v2314_v28, %v2470_v7 }
 0x1c8   :  { %vm216_vm3 = vmor %vm214_vm2, %vm215_vm1 }
 0x1c9   :  { %v210_v4 = vmul.f32 %v2057_v2, %v209_v3 }
 0x1cb   :  { %v211_v5 = vmul.f32 0.5, %v210_v4 }
 0x1cd   :  { %v212_v6 = vsub.f32 1.5, %v211_v5 }
 0x1cf   :  { %v213_v8 = vmul.f32 %v2057_v2, %v212_v6 }
 0x1d1   :  { %v217_v10 = vsel %vm216_vm3, %v2057_v2, %v213_v8  ;;  %v195_v8 = vsub.f32 %v2316_v29, %v2470_v7 }
 0x1d2   :  { %v2475_v11 = vperm.slane %v217_v10, 0 }
 0x1d4   :  { %v219_v15 = vmul.f32 %v2475_v11, %v191_v12  ;;  %v220_v17 = vmul.f32 %v2475_v11, %v192_v14  ;;  %v221_v35 = vmul.f32 %v2475_v11, %v193_v20  ;;  %v227_v37 = vmul.f32 %v2475_v11, %v199_v22 }
 0x1d5   :  { %v228_v38 = vmul.f32 %v2475_v11, %v200_v23  ;;  %v229_v43 = vmul.f32 %v2475_v11, %v201_v24  ;;  %v230_v39 = vmul.f32 %v2475_v11, %v202_v25  ;;  %v231_v44 = vmul.f32 %v2475_v11, %v203_v26  ;;  %v2007_v25 = vld [vmem:[%s3321_s2 + $0x20] sm:$0xff] }
 0x1d6   :  { %v236_v18 = vmul.f32 %v2479_v13, %v219_v15  ;;  %v237_v19 = vmul.f32 %v2479_v13, %v220_v17  ;;  %v232_v45 = vmul.f32 %v2475_v11, %v204_v27  ;;  %v233_v46 = vmul.f32 %v2475_v11, %v205_v42  ;;  %v2006_v42 = vld [vmem:[%s3321_s2 + $0x18] sm:$0xff] }
 0x1d7   :  { %v234_v47 = vmul.f32 %v2475_v11, %v206_v36  ;;  %v244_v48 = vmul.f32 %v2479_v13, %v227_v37  ;;  %v245_v40 = vmul.f32 %v2479_v13, %v228_v38  ;;  %v246_v49 = vmul.f32 %v2479_v13, %v229_v43  ;;  %v2005_v43 = vld [vmem:[%s3321_s2 + $0x10] sm:$0xff] }
 0x1d8   :  { %v2492_v21 = vadd.f32 %v2484_v16, %v236_v18  ;;  %v2512_v34 = vadd.f32 %v2484_v16, %v237_v19  ;;  %v247_v50 = vmul.f32 %v2479_v13, %v230_v39  ;;  %v248_v51 = vmul.f32 %v2479_v13, %v231_v44 }
 0x1d9   :  { %v249_v52 = vmul.f32 %v2479_v13, %v232_v45  ;;  %v250_v53 = vmul.f32 %v2479_v13, %v233_v46  ;;  %v251_v54 = vmul.f32 %v2479_v13, %v234_v47  ;;  %v2534_v55 = vadd.f32 %v2484_v16, %v244_v48  ;;  %v2004_v47 = vld [vmem:[%s3321_s2 + $0x8] sm:$0xff] }
 0x1da   :  { %301 = vmatmul.f32.vlgmr.msra.gmra.mxu3 %v2492_v21  ;;  %v269_v33 = vmul.f32 %v2492_v21, %v2492_v21  ;;  %v2537_v56 = vadd.f32 %v2484_v16, %v245_v40  ;;  %v2540_v57 = vadd.f32 %v2484_v16, %v246_v49  ;;  %v2543_v58 = vadd.f32 %v2484_v16, %v247_v50  ;;  %v2003_v50 = vld [vmem:[%s3321_s2] sm:$0xff] }
 0x1db   :  { %v2546_v59 = vadd.f32 %v2484_v16, %v248_v51  ;;  %v2549_v60 = vadd.f32 %v2484_v16, %v249_v52  ;;  %v2552_v61 = vadd.f32 %v2484_v16, %v250_v53  ;;  %v2555_v62 = vadd.f32 %v2484_v16, %v251_v54 }
 0x1dc   :  { %382 = vmatmul.f32.vlgmr.msra.gmra.mxu1 %v269_v33  ;;  %v270_v63 = vmul.f32 %v2512_v34, %v2512_v34  ;;  %v238_v0 = vmul.f32 %v2479_v13, %v221_v35  ;;  %v222_v3 = vmul.f32 %v2475_v11, %v194_v1  ;;  %v223_v28 = vmul.f32 %v2475_v11, %v195_v8 }
 0x1dd   :  { %v196_v12 = vsub.f32 %v2318_v30, %v2470_v7  ;;  %v197_v17 = vsub.f32 %v2320_v31, %v2470_v7  ;;  %v198_v20 = vsub.f32 %v2322_v32, %v2470_v7  ;;  %v2010_v32 = vld [vmem:[%s3321_s2 + $0x38] sm:$0xff]  ;;  %v2009_v7 = vld [vmem:[%s3321_s2 + $0x30] sm:$0xff] }
 0x1de   :  { %v2564_v2 = vadd.f32 %v2484_v16, %v238_v0  ;;  %v239_v5 = vmul.f32 %v2479_v13, %v222_v3  ;;  %v240_v10 = vmul.f32 %v2479_v13, %v223_v28  ;;  %791 = vmatpush.bf16.msra.mxu2 %v2010_v32 }
 0x1df   :  { %v224_v15 = vmul.f32 %v2475_v11, %v196_v12  ;;  %v225_v19 = vmul.f32 %v2475_v11, %v197_v17  ;;  %v226_v23 = vmul.f32 %v2475_v11, %v198_v20  ;;  %v2008_v11 = vld [vmem:[%s3321_s2 + $0x28] sm:$0xff] }
 0x1e0   :  { %v271_v4 = vmul.f32 %v2564_v2, %v2564_v2  ;;  %v2572_v6 = vadd.f32 %v2484_v16, %v239_v5  ;;  %v2584_v14 = vadd.f32 %v2484_v16, %v240_v10 }
 0x1e1   :  { %v241_v29 = vmul.f32 %v2479_v13, %v224_v15  ;;  %v242_v30 = vmul.f32 %v2479_v13, %v225_v19  ;;  %v243_v31 = vmul.f32 %v2479_v13, %v226_v23 }
 0x1e2   :  { %304 = vmatmul.f32.gmra.mxu3 %v2512_v34  ;;  %v272_v9 = vmul.f32 %v2572_v6, %v2572_v6  ;;  %792 = vmatpush.bf16.msra.mxu2 %v2009_v7  ;;  %v273_v13 = vmul.f32 %v2584_v14, %v2584_v14  ;;  %v277_v7 = vmul.f32 %v2534_v55, %v2534_v55 }
 0x1e3   :  { %v2592_v18 = vadd.f32 %v2484_v16, %v241_v29  ;;  %v2600_v22 = vadd.f32 %v2484_v16, %v242_v30  ;;  %v2606_v24 = vadd.f32 %v2484_v16, %v243_v31 }
 0x1e4   :  { %385 = vmatmul.f32.gmra.mxu1 %v270_v63 }
 0x1e5   :  { %v274_v36 = vmul.f32 %v2592_v18, %v2592_v18  ;;  %v275_v49 = vmul.f32 %v2600_v22, %v2600_v22  ;;  %v276_v8 = vmul.f32 %v2606_v24, %v2606_v24 }
 0x1e6   :  { %793 = vmatpush.bf16.msra.mxu2 %v2008_v11 }
 0x1ea   :  { %307 = vmatmul.f32.gmra.mxu3 %v2564_v2  ;;  %794 = vmatpush.bf16.msra.mxu2 %v2007_v25 }
 0x1ec   :  { %388 = vmatmul.f32.gmra.mxu1 %v271_v4 }
 0x1ee   :  { %795 = vmatpush.bf16.msra.mxu2 %v2006_v42 }
 0x1f2   :  { %310 = vmatmul.f32.gmra.mxu3 %v2572_v6  ;;  %796 = vmatpush.bf16.msra.mxu2 %v2005_v43 }
 0x1f4   :  { %391 = vmatmul.f32.gmra.mxu1 %v272_v9 }
 0x1f6   :  { %797 = vmatpush.bf16.msra.mxu2 %v2004_v47  ;;  %v278_v47 = vmul.f32 %v2537_v56, %v2537_v56 }
 0x1fa   :  { %313 = vmatmul.f32.gmra.mxu3 %v2584_v14  ;;  %798 = vmatpush.bf16.msra.mxu2 %v2003_v50 }
 0x202   :  { %316 = vmatmul.f32.gmra.mxu3 %v2592_v18 }
 0x20a   :  { %319 = vmatmul.f32.gmra.mxu3 %v2600_v22 }
 0x212   :  { %322 = vmatmul.f32.gmra.mxu3 %v2606_v24 }
 0x21a   :  { %325 = vmatmul.f32.gmra.mxu3 %v2534_v55 }
 0x222   :  { %328 = vmatmul.f32.gmra.mxu3 %v2537_v56 }
 0x22a   :  { %331 = vmatmul.f32.gmra.mxu3 %v2540_v57 }
 0x232   :  { %334 = vmatmul.f32.gmra.mxu3 %v2543_v58 }
 0x23a   :  { %337 = vmatmul.f32.gmra.mxu3 %v2546_v59 }
 0x242   :  { %340 = vmatmul.f32.gmra.mxu3 %v2549_v60 }
 0x24a   :  { %343 = vmatmul.f32.gmra.mxu3 %v2552_v61 }
 0x252   :  { %346 = vmatmul.f32.gmra.mxu3 %v2555_v62 }
 0x259   :  { %v383_v16 = vpop.f32.mrf.mxu1 }
 0x25a   :  { %394 = vmatmul.f32.vlgmr.msrb.gmra.mxu3 %v273_v13  ;;  %v431_v33 = vmul.f32 0.03125, %v383_v16 }
 0x25d   :  { %v302_v26 = vpop.f32.mrf.mxu3 }
 0x25e   :  { %v2631_v27 = vmul.f32 0.03125, %v302_v26 }
 0x260   :  { %v447_v35 = vmul.f32 %v2631_v27, %v2631_v27 }
 0x261   :  { %v386_v37 = vpop.f32.mrf.mxu1 }
 0x262   :  { %v463_v38 = vsub.f32 %v431_v33, %v447_v35  ;;  %397 = vmatmul.f32.gmra.mxu3 %v274_v36  ;;  %v432_v48 = vmul.f32 0.03125, %v386_v37 }
 0x264   :  { %v479_v39 = vmax.f32 %v463_v38, 0.0  ;;  %v495_v38 = vsub.f32 %v2492_v21, %v2631_v27 }
 0x265   :  { %v305_v44 = vpop.f32.mrf.mxu3 }
 0x266   :  { %v511_v45 = vadd.f32 1e-05, %v479_v39  ;;  %v2643_v46 = vmul.f32 0.03125, %v305_v44 }
 0x268   :  { %2058 = vrsqrt.f32 %v511_v45  ;;  %v448_v40 = vmul.f32 %v2643_v46, %v2643_v46  ;;  %vm533_vm5 = vweird.f32 %v511_v45 }
 0x269   :  { %v389_v52 = vpop.f32.mrf.mxu1 }
 0x26a   :  { %v464_v51 = vsub.f32 %v432_v48, %v448_v40  ;;  %400 = vmatmul.f32.gmra.mxu3 %v275_v49  ;;  %v433_v4 = vmul.f32 0.03125, %v389_v52 }
 0x26c   :  { %v480_v53 = vmax.f32 %v464_v51, 0.0 }
 0x26d   :  { %v308_v54 = vpop.f32.mrf.mxu3 }
 0x26e   :  { %v2059_v63 = vpop.eup %2058  ;;  %v512_v0 = vadd.f32 1e-05, %v480_v53  ;;  %v2655_v1 = vmul.f32 0.03125, %v308_v54 }
 0x26f   :  { %v528_v3 = vmul.f32 %v2059_v63, %v511_v45  ;;  %vm534_vm4 = vweird.f32 %v2059_v63  ;;  %v496_v45 = vsub.f32 %v2512_v34, %v2643_v46  ;;  %v279_v34 = vmul.f32 %v2540_v57, %v2540_v57 }
 0x270   :  { %2060 = vrsqrt.f32 %v512_v0  ;;  %v449_v5 = vmul.f32 %v2655_v1, %v2655_v1  ;;  %vm2667_vm6 = vmor %vm533_vm5, %vm534_vm4  ;;  %vm543_vm8 = vweird.f32 %v512_v0 }
 0x271   :  { %v529_v28 = vmul.f32 %v2059_v63, %v528_v3  ;;  %v392_v15 = vpop.f32.mrf.mxu1 }
 0x272   :  { %v465_v9 = vsub.f32 %v433_v4, %v449_v5  ;;  %403 = vmatmul.f32.gmra.mxu3 %v276_v8  ;;  %v434_v31 = vmul.f32 0.03125, %v392_v15  ;;  %v280_v15 = vmul.f32 %v2543_v58, %v2543_v58 }
 0x273   :  { %v530_v10 = vmul.f32 0.5, %v529_v28 }
 0x274   :  { %v481_v12 = vmax.f32 %v465_v9, 0.0  ;;  %v497_v9 = vsub.f32 %v2564_v2, %v2655_v1  ;;  %v281_v2 = vmul.f32 %v2546_v59, %v2546_v59 }
 0x275   :  { %v311_v29 = vpop.f32.mrf.mxu3  ;;  %v531_v17 = vsub.f32 1.5, %v530_v10 }
 0x276   :  { %v2061_v19 = vpop.eup %2060  ;;  %v513_v30 = vadd.f32 1e-05, %v481_v12  ;;  %v2661_v20 = vmul.f32 0.03125, %v311_v29 }
 0x277   :  { %v538_v23 = vmul.f32 %v2061_v19, %v512_v0  ;;  %v532_v11 = vmul.f32 %v2059_v63, %v531_v17  ;;  %vm544_vm7 = vweird.f32 %v2061_v19 }
 0x278   :  { %2062 = vrsqrt.f32 %v513_v30  ;;  %v450_v32 = vmul.f32 %v2661_v20, %v2661_v20  ;;  %vm545_vm9 = vmor %vm543_vm8, %vm544_vm7  ;;  %vm553_vm11 = vweird.f32 %v513_v30  ;;  %v498_v12 = vsub.f32 %v2572_v6, %v2661_v20 }
 0x279   :  { %v539_v13 = vmul.f32 %v2061_v19, %v538_v23  ;;  %v536_v35 = vsel %vm2667_vm6, %v2059_v63, %v532_v11  ;;  %v282_v6 = vmul.f32 %v2549_v60, %v2549_v60 }
 0x27a   :  { %v466_v16 = vsub.f32 %v434_v31, %v450_v32  ;;  %406 = vmatmul.f32.gmra.mxu3 %v277_v7  ;;  %v687_v48 = vmul.f32 %v536_v35, %v495_v38  ;;  %v283_v7 = vmul.f32 %v2552_v61, %v2552_v61 }
 0x27b   :  { %v540_v25 = vmul.f32 0.5, %v539_v13  ;;  %v284_v13 = vmul.f32 %v2555_v62, %v2555_v62 }
 0x27c   :  { %v482_v26 = vmax.f32 %v466_v16, 0.0  ;;  %v703_v52 = vmax.f32 %v687_v48, 0.0 }
 0x27d   :  { %v2671_v33 = vpop.f32.mrf.mxu3  ;;  %v541_v36 = vsub.f32 1.5, %v540_v25 }
 0x27e   :  { %v2063_v37 = vpop.eup %2062  ;;  %v514_v43 = vadd.f32 1e-05, %v482_v26 }
 0x27f   :  { %v548_v39 = vmul.f32 %v2063_v37, %v513_v30  ;;  %v542_v44 = vmul.f32 %v2061_v19, %v541_v36  ;;  %vm554_vm10 = vweird.f32 %v2063_v37  ;;  %v354_v36 = vmul.f32 0.03125, %v2671_v33 }
 0x280   :  { %2064 = vrsqrt.f32 %v514_v43  ;;  %vm555_vm12 = vmor %vm553_vm11, %vm554_vm10  ;;  %vm563_vm14 = vweird.f32 %v514_v43 }
 0x281   :  { %v546_v40 = vsel %vm545_vm9, %v2061_v19, %v542_v44  ;;  %v549_v49 = vmul.f32 %v2063_v37, %v548_v39  ;;  %v451_v38 = vmul.f32 %v354_v36, %v354_v36 }
 0x282   :  { %409 = vmatmul.f32.gmra.mxu3 %v278_v47  ;;  %v688_v50 = vmul.f32 %v546_v40, %v496_v45 }
 0x283   :  { %v550_v51 = vmul.f32 0.5, %v549_v49 }
 0x284   :  { %v704_v21 = vmax.f32 %v688_v50, 0.0 }
 0x285   :  { %v317_v27 = vpop.f32.mrf.mxu3  ;;  %v551_v53 = vsub.f32 1.5, %v550_v51 }
 0x286   :  { %v2065_v54 = vpop.eup %2064  ;;  %v719_v63 = vpack.c.bf16 %v704_v21, %v703_v52  ;;  %v355_v44 = vmul.f32 0.03125, %v317_v27 }
 0x287   :  { %v558_v0 = vmul.f32 %v2065_v54, %v514_v43  ;;  %v552_v46 = vmul.f32 %v2063_v37, %v551_v53  ;;  %vm564_vm13 = vweird.f32 %v2065_v54 }
 0x288   :  { %799 = vmatmul.bf16.vlgmr.msra.gmra.mxu2 %v719_v63  ;;  %vm565_vm15 = vmor %vm563_vm14, %vm564_vm13  ;;  %v452_v40 = vmul.f32 %v355_v44, %v355_v44 }
 0x289   :  { %v559_v3 = vmul.f32 %v2065_v54, %v558_v0  ;;  %v556_v8 = vsel %vm555_vm12, %v2063_v37, %v552_v46 }
 0x28a   :  { %412 = vmatmul.f32.gmra.mxu3 %v279_v34  ;;  %v689_v29 = vmul.f32 %v556_v8, %v497_v9 }
 0x28b   :  { %v560_v4 = vmul.f32 0.5, %v559_v3 }
 0x28c   :  { %v705_v30 = vmax.f32 %v689_v29, 0.0 }
 0x28d   :  { %v320_v5 = vpop.f32.mrf.mxu3  ;;  %v561_v28 = vsub.f32 1.5, %v560_v4 }
 0x28e   :  { %v2712_v51 = vmul.f32 0.03125, %v320_v5 }
 0x28f   :  { %v562_v10 = vmul.f32 %v2065_v54, %v561_v28 }
 0x290   :  { %v453_v33 = vmul.f32 %v2712_v51, %v2712_v51 }
 0x291   :  { %v566_v17 = vsel %vm565_vm15, %v2065_v54, %v562_v10 }
 0x292   :  { %415 = vmatmul.f32.gmra.mxu3 %v280_v15  ;;  %v690_v19 = vmul.f32 %v566_v17, %v498_v12 }
 0x294   :  { %v706_v23 = vmax.f32 %v690_v19, 0.0 }
 0x295   :  { %v323_v31 = vpop.f32.mrf.mxu3 }
 0x296   :  { %v720_v32 = vpack.c.bf16 %v706_v23, %v705_v30  ;;  %v2716_v3 = vmul.f32 0.03125, %v323_v31 }
 0x298   :  { %804 = vmatmul.bf16.gmra.mxu2 %v720_v32  ;;  %v454_v12 = vmul.f32 %v2716_v3, %v2716_v3 }
 0x29a   :  { %418 = vmatmul.f32.gmra.mxu3 %v281_v2 }
 0x29d   :  { %v326_v1 = vpop.f32.mrf.mxu3 }
 0x29e   :  { %v2720_v23 = vmul.f32 0.03125, %v326_v1 }
 0x2a2   :  { %421 = vmatmul.f32.gmra.mxu3 %v282_v6 }
 0x2a5   :  { %v2693_v20 = vpop.f32.mrf.mxu3 }
 0x2aa   :  { %424 = vmatmul.f32.gmra.mxu3 %v283_v7 }
 0x2ad   :  { %v2697_v11 = vpop.f32.mrf.mxu3 }
 0x2b2   :  { %427 = vmatmul.f32.gmra.mxu3 %v284_v13  ;;  %v499_v13 = vsub.f32 %v2584_v14, %v354_v36  ;;  %v2733_v14 = vmul.f32 0.03125, %v2693_v20 }
 0x2b5   :  { %v2701_v16 = vpop.f32.mrf.mxu3 }
 0x2bd   :  { %v2703_v25 = vpop.f32.mrf.mxu3 }
 0x2c5   :  { %v2705_v26 = vpop.f32.mrf.mxu3 }
 0x2cd   :  { %v2707_v42 = vpop.f32.mrf.mxu3 }
 0x2d5   :  { %v2709_v35 = vpop.f32.mrf.mxu3 }
 0x2dd   :  { %v395_v37 = vpop.f32.mrf.mxu3 }
 0x2de   :  { %v435_v43 = vmul.f32 0.03125, %v395_v37 }
 0x2e0   :  { %v467_v39 = vsub.f32 %v435_v43, %v451_v38  ;;  %v500_v38 = vsub.f32 %v2592_v18, %v355_v44 }
 0x2e2   :  { %v483_v45 = vmax.f32 %v467_v39, 0.0 }
 0x2e4   :  { %v515_v47 = vadd.f32 1e-05, %v483_v45  ;;  %v455_v45 = vmul.f32 %v2720_v23, %v2720_v23 }
 0x2e5   :  { %v398_v48 = vpop.f32.mrf.mxu3 }
 0x2e6   :  { %2066 = vrsqrt.f32 %v515_v47  ;;  %v436_v49 = vmul.f32 0.03125, %v398_v48  ;;  %vm573_vm1 = vweird.f32 %v515_v47 }
 0x2e8   :  { %v468_v50 = vsub.f32 %v436_v49, %v452_v40 }
 0x2ea   :  { %v484_v52 = vmax.f32 %v468_v50, 0.0 }
 0x2ec   :  { %v2067_v21 = vpop.eup %2066  ;;  %v516_v53 = vadd.f32 1e-05, %v484_v52 }
 0x2ed   :  { %v568_v54 = vmul.f32 %v2067_v21, %v515_v47  ;;  %v401_v63 = vpop.f32.mrf.mxu3  ;;  %vm574_vm0 = vweird.f32 %v2067_v21 }
 0x2ee   :  { %2068 = vrsqrt.f32 %v516_v53  ;;  %v437_v0 = vmul.f32 0.03125, %v401_v63  ;;  %vm2722_vm2 = vmor %vm573_vm1, %vm574_vm0  ;;  %vm583_vm4 = vweird.f32 %v516_v53 }
 0x2ef   :  { %v569_v27 = vmul.f32 %v2067_v21, %v568_v54 }
 0x2f0   :  { %v469_v34 = vsub.f32 %v437_v0, %v453_v33 }
 0x2f1   :  { %v570_v46 = vmul.f32 0.5, %v569_v27 }
 0x2f2   :  { %v485_v4 = vmax.f32 %v469_v34, 0.0  ;;  %v456_v34 = vmul.f32 %v2733_v14, %v2733_v14 }
 0x2f3   :  { %v571_v8 = vsub.f32 1.5, %v570_v46 }
 0x2f4   :  { %v2069_v28 = vpop.eup %2068  ;;  %v517_v5 = vadd.f32 1e-05, %v485_v4 }
 0x2f5   :  { %v578_v9 = vmul.f32 %v2069_v28, %v516_v53  ;;  %v404_v10 = vpop.f32.mrf.mxu3  ;;  %v572_v17 = vmul.f32 %v2067_v21, %v571_v8  ;;  %vm584_vm3 = vweird.f32 %v2069_v28 }
 0x2f6   :  { %2070 = vrsqrt.f32 %v517_v5  ;;  %v438_v15 = vmul.f32 0.03125, %v404_v10  ;;  %vm585_vm5 = vmor %vm583_vm4, %vm584_vm3  ;;  %vm593_vm7 = vweird.f32 %v517_v5 }
 0x2f7   :  { %v579_v29 = vmul.f32 %v2069_v28, %v578_v9  ;;  %v576_v6 = vsel %vm2722_vm2, %v2067_v21, %v572_v17  ;;  %v2738_v9 = vmul.f32 0.03125, %v2697_v11 }
 0x2f8   :  { %v470_v19 = vsub.f32 %v438_v15, %v454_v12  ;;  %v691_v48 = vmul.f32 %v576_v6, %v499_v13 }
 0x2f9   :  { %v580_v30 = vmul.f32 0.5, %v579_v29 }
 0x2fa   :  { %v486_v31 = vmax.f32 %v470_v19, 0.0  ;;  %v707_v36 = vmax.f32 %v691_v48, 0.0  ;;  %v501_v19 = vsub.f32 %v2600_v22, %v2712_v51  ;;  %v2753_v51 = vmul.f32 0.03125, %v2701_v16 }
 0x2fb   :  { %v581_v2 = vsub.f32 1.5, %v580_v30 }
 0x2fc   :  { %v2071_v7 = vpop.eup %2070  ;;  %v518_v37 = vadd.f32 1e-05, %v486_v31 }
 0x2fd   :  { %v588_v43 = vmul.f32 %v2071_v7, %v517_v5  ;;  %v407_v1 = vpop.f32.mrf.mxu3  ;;  %v582_v39 = vmul.f32 %v2069_v28, %v581_v2  ;;  %vm594_vm6 = vweird.f32 %v2071_v7  ;;  %v502_v5 = vsub.f32 %v2606_v24, %v2716_v3 }
 0x2fe   :  { %2072 = vrsqrt.f32 %v518_v37  ;;  %v439_v47 = vmul.f32 0.03125, %v407_v1  ;;  %vm2740_vm8 = vmor %vm593_vm7, %vm594_vm6  ;;  %vm603_vm10 = vweird.f32 %v518_v37  ;;  %v457_v2 = vmul.f32 %v2738_v9, %v2738_v9 }
 0x2ff   :  { %v589_v40 = vmul.f32 %v2071_v7, %v588_v43  ;;  %v586_v49 = vsel %vm585_vm5, %v2069_v28, %v582_v39 }
 0x300   :  { %v471_v50 = vsub.f32 %v439_v47, %v455_v45  ;;  %v692_v52 = vmul.f32 %v586_v49, %v500_v38 }
 0x301   :  { %v590_v21 = vmul.f32 0.5, %v589_v40 }
 0x302   :  { %v487_v18 = vmax.f32 %v471_v50, 0.0  ;;  %v708_v44 = vmax.f32 %v692_v52, 0.0  ;;  %v458_v50 = vmul.f32 %v2753_v51, %v2753_v51 }
 0x303   :  { %v591_v53 = vsub.f32 1.5, %v590_v21 }
 0x304   :  { %v2073_v54 = vpop.eup %2072  ;;  %v519_v63 = vadd.f32 1e-05, %v487_v18  ;;  %v721_v33 = vpack.c.bf16 %v708_v44, %v707_v36  ;;  %v2758_v44 = vmul.f32 0.03125, %v2703_v25 }
 0x305   :  { %v598_v0 = vmul.f32 %v2073_v54, %v518_v37  ;;  %v410_v27 = vpop.f32.mrf.mxu3  ;;  %v592_v8 = vmul.f32 %v2071_v7, %v591_v53  ;;  %vm604_vm9 = vweird.f32 %v2073_v54 }
 0x306   :  { %2074 = vrsqrt.f32 %v519_v63  ;;  %v440_v46 = vmul.f32 0.03125, %v410_v27  ;;  %809 = vmatmul.bf16.gmra.mxu2 %v721_v33  ;;  %vm605_vm11 = vmor %vm603_vm10, %vm604_vm9  ;;  %vm613_vm13 = vweird.f32 %v519_v63 }
 0x307   :  { %v599_v4 = vmul.f32 %v2073_v54, %v598_v0  ;;  %v596_v29 = vsel %vm2740_vm8, %v2071_v7, %v592_v8 }
 0x308   :  { %v472_v20 = vsub.f32 %v440_v46, %v456_v34  ;;  %v693_v7 = vmul.f32 %v596_v29, %v501_v19  ;;  %v503_v34 = vsub.f32 %v2534_v55, %v2720_v23  ;;  %v2773_v23 = vmul.f32 0.03125, %v2705_v26 }
 0x309   :  { %v600_v28 = vmul.f32 0.5, %v599_v4 }
 0x30a   :  { %v488_v10 = vmax.f32 %v472_v20, 0.0  ;;  %v709_v3 = vmax.f32 %v693_v7, 0.0  ;;  %v459_v20 = vmul.f32 %v2758_v44, %v2758_v44 }
 0x30b   :  { %v601_v15 = vsub.f32 1.5, %v600_v28 }
 0x30c   :  { %v2075_v17 = vpop.eup %2074  ;;  %v520_v30 = vadd.f32 1e-05, %v488_v10 }
 0x30d   :  { %v608_v11 = vmul.f32 %v2075_v17, %v519_v63  ;;  %v413_v31 = vpop.f32.mrf.mxu3  ;;  %v602_v32 = vmul.f32 %v2073_v54, %v601_v15  ;;  %vm614_vm12 = vweird.f32 %v2075_v17  ;;  %v504_v63 = vsub.f32 %v2537_v56, %v2733_v14 }
 0x30e   :  { %2076 = vrsqrt.f32 %v520_v30  ;;  %v441_v6 = vmul.f32 0.03125, %v413_v31  ;;  %vm2760_vm14 = vmor %vm613_vm13, %vm614_vm12  ;;  %vm623_vm0 = vweird.f32 %v520_v30 }
 0x30f   :  { %v609_v13 = vmul.f32 %v2075_v17, %v608_v11  ;;  %v606_v38 = vsel %vm605_vm11, %v2073_v54, %v602_v32 }
 0x310   :  { %v473_v43 = vsub.f32 %v441_v6, %v457_v2  ;;  %v694_v1 = vmul.f32 %v606_v38, %v502_v5  ;;  %v460_v6 = vmul.f32 %v2773_v23, %v2773_v23 }
 0x311   :  { %v610_v22 = vmul.f32 0.5, %v609_v13 }
 0x312   :  { %v489_v24 = vmax.f32 %v473_v43, 0.0  ;;  %v710_v37 = vmax.f32 %v694_v1, 0.0  ;;  %v2778_v1 = vmul.f32 0.03125, %v2707_v42 }
 0x313   :  { %v611_v39 = vsub.f32 1.5, %v610_v22 }
 0x314   :  { %v2077_v45 = vpop.eup %2076  ;;  %v521_v47 = vadd.f32 1e-05, %v489_v24  ;;  %v722_v48 = vpack.c.bf16 %v710_v37, %v709_v3 }
 0x315   :  { %v618_v40 = vmul.f32 %v2077_v45, %v520_v30  ;;  %v416_v49 = vpop.f32.mrf.mxu3  ;;  %v612_v18 = vmul.f32 %v2075_v17, %v611_v39  ;;  %vm624_vm15 = vweird.f32 %v2077_v45 }
 0x316   :  { %2078 = vrsqrt.f32 %v521_v47  ;;  %v442_v52 = vmul.f32 0.03125, %v416_v49  ;;  %814 = vmatmul.bf16.gmra.mxu2 %v722_v48  ;;  %vm625_vm1 = vmor %vm623_vm0, %vm624_vm15  ;;  %vm633_vm3 = vweird.f32 %v521_v47 }
 0x317   :  { %v619_v21 = vmul.f32 %v2077_v45, %v618_v40  ;;  %v616_v0 = vsel %vm2760_vm14, %v2075_v17, %v612_v18 }
 0x318   :  { %v474_v16 = vsub.f32 %v442_v52, %v458_v50  ;;  %v695_v10 = vmul.f32 %v616_v0, %v503_v34  ;;  %v461_v50 = vmul.f32 %v2778_v1, %v2778_v1 }
 0x319   :  { %v620_v36 = vmul.f32 0.5, %v619_v21 }
 0x31a   :  { %v490_v53 = vmax.f32 %v474_v16, 0.0  ;;  %v711_v14 = vmax.f32 %v695_v10, 0.0 }
 0x31b   :  { %v621_v33 = vsub.f32 1.5, %v620_v36 }
 0x31c   :  { %v2079_v27 = vpop.eup %2078  ;;  %v522_v46 = vadd.f32 1e-05, %v490_v53 }
 0x31d   :  { %v628_v25 = vmul.f32 %v2079_v27, %v521_v47  ;;  %v419_v4 = vpop.f32.mrf.mxu3  ;;  %v622_v8 = vmul.f32 %v2077_v45, %v621_v33  ;;  %vm634_vm2 = vweird.f32 %v2079_v27  ;;  %v506_v47 = vsub.f32 %v2543_v58, %v2753_v51 }
 0x31e   :  { %2080 = vrsqrt.f32 %v522_v46  ;;  %v443_v28 = vmul.f32 0.03125, %v419_v4  ;;  %vm2780_vm4 = vmor %vm633_vm3, %vm634_vm2  ;;  %vm643_vm6 = vweird.f32 %v522_v46 }
 0x31f   :  { %v629_v12 = vmul.f32 %v2079_v27, %v628_v25  ;;  %v626_v15 = vsel %vm625_vm1, %v2077_v45, %v622_v8  ;;  %v505_v45 = vsub.f32 %v2540_v57, %v2738_v9  ;;  %v2793_v9 = vmul.f32 0.03125, %v2709_v35 }
 0x320   :  { %v475_v29 = vsub.f32 %v443_v28, %v459_v20  ;;  %v696_v17 = vmul.f32 %v626_v15, %v504_v63 }
 0x321   :  { %v630_v55 = vmul.f32 0.5, %v629_v12  ;;  %v462_v25 = vmul.f32 %v2793_v9, %v2793_v9 }
 0x322   :  { %v491_v56 = vmax.f32 %v475_v29, 0.0  ;;  %v712_v19 = vmax.f32 %v696_v17, 0.0  ;;  %v507_v17 = vsub.f32 %v2546_v59, %v2758_v44 }
 0x323   :  { %v631_v30 = vsub.f32 1.5, %v630_v55 }
 0x324   :  { %v2081_v5 = vpop.eup %2080  ;;  %v523_v11 = vadd.f32 1e-05, %v491_v56  ;;  %v723_v31 = vpack.c.bf16 %v712_v19, %v711_v14  ;;  %v508_v19 = vsub.f32 %v2549_v60, %v2773_v23 }
 0x325   :  { %v638_v32 = vmul.f32 %v2081_v5, %v522_v46  ;;  %v422_v2 = vpop.f32.mrf.mxu3  ;;  %v632_v38 = vmul.f32 %v2079_v27, %v631_v30  ;;  %vm644_vm5 = vweird.f32 %v2081_v5 }
 0x326   :  { %2082 = vrsqrt.f32 %v523_v11  ;;  %v444_v7 = vmul.f32 0.03125, %v422_v2  ;;  %819 = vmatmul.bf16.gmra.mxu2 %v723_v31  ;;  %vm645_vm7 = vmor %vm643_vm6, %vm644_vm5  ;;  %vm653_vm9 = vweird.f32 %v523_v11 }
 0x327   :  { %v639_v13 = vmul.f32 %v2081_v5, %v638_v32  ;;  %v636_v37 = vsel %vm2780_vm4, %v2079_v27, %v632_v38 }
 0x328   :  { %v476_v26 = vsub.f32 %v444_v7, %v460_v6  ;;  %v697_v21 = vmul.f32 %v636_v37, %v505_v45 }
 0x329   :  { %v640_v43 = vmul.f32 0.5, %v639_v13 }
 0x32a   :  { %v492_v22 = vmax.f32 %v476_v26, 0.0  ;;  %v713_v51 = vmax.f32 %v697_v21, 0.0 }
 0x32b   :  { %v641_v3 = vsub.f32 1.5, %v640_v43 }
 0x32c   :  { %v2083_v39 = vpop.eup %2082  ;;  %v524_v48 = vadd.f32 1e-05, %v492_v22  ;;  %v509_v22 = vsub.f32 %v2552_v61, %v2778_v1 }
 0x32d   :  { %v648_v42 = vmul.f32 %v2083_v39, %v523_v11  ;;  %v425_v40 = vpop.f32.mrf.mxu3  ;;  %v642_v49 = vmul.f32 %v2081_v5, %v641_v3  ;;  %vm654_vm8 = vweird.f32 %v2083_v39  ;;  %v510_v3 = vsub.f32 %v2555_v62, %v2793_v9 }
 0x32e   :  { %2084 = vrsqrt.f32 %v524_v48  ;;  %v445_v52 = vmul.f32 0.03125, %v425_v40  ;;  %vm655_vm10 = vmor %vm653_vm9, %vm654_vm8  ;;  %vm663_vm12 = vweird.f32 %v524_v48  ;;  %v2805_v40 = vpop.f32.mrf.mxu2 }
 0x32f   :  { %v649_v18 = vmul.f32 %v2083_v39, %v648_v42  ;;  %v646_v16 = vsel %vm645_vm7, %v2081_v5, %v642_v49 }
 0x330   :  { %v477_v36 = vsub.f32 %v445_v52, %v461_v50  ;;  %v698_v53 = vmul.f32 %v646_v16, %v506_v47 }
 0x331   :  { %v650_v57 = vmul.f32 0.5, %v649_v18 }
 0x332   :  { %v493_v58 = vmax.f32 %v477_v36, 0.0  ;;  %v714_v54 = vmax.f32 %v698_v53, 0.0 }
 0x333   :  { %v651_v33 = vsub.f32 1.5, %v650_v57 }
 0x334   :  { %v2085_v0 = vpop.eup %2084  ;;  %v525_v27 = vadd.f32 1e-05, %v493_v58  ;;  %v724_v34 = vpack.c.bf16 %v714_v54, %v713_v51 }
 0x335   :  { %v658_v46 = vmul.f32 %v2085_v0, %v524_v48  ;;  %v428_v63 = vpop.f32.mrf.mxu3  ;;  %v652_v20 = vmul.f32 %v2083_v39, %v651_v33  ;;  %vm664_vm11 = vweird.f32 %v2085_v0 }
 0x336   :  { %2086 = vrsqrt.f32 %v525_v27  ;;  %v446_v4 = vmul.f32 0.03125, %v428_v63  ;;  %824 = vmatmul.bf16.gmra.mxu2 %v724_v34  ;;  %vm665_vm13 = vmor %vm663_vm12, %vm664_vm11  ;;  %vm673_vm15 = vweird.f32 %v525_v27  ;;  %v2807_v49 = vpop.f32.mrf.mxu2 }
 0x337   :  { %v659_v8 = vmul.f32 %v2085_v0, %v658_v46  ;;  %v656_v15 = vsel %vm655_vm10, %v2083_v39, %v652_v20 }
 0x338   :  { %v478_v35 = vsub.f32 %v446_v4, %v462_v25  ;;  %v699_v30 = vmul.f32 %v656_v15, %v507_v17  ;;  %v840_v15 = vmul.f32 %v2805_v40, %v2805_v40 }
 0x339   :  { %v660_v28 = vmul.f32 0.5, %v659_v8 }
 0x33a   :  { %v494_v10 = vmax.f32 %v478_v35, 0.0  ;;  %v715_v2 = vmax.f32 %v699_v30, 0.0 }
 0x33b   :  { %v661_v12 = vsub.f32 1.5, %v660_v28 }
 0x33c   :  { %v2087_v29 = vpop.eup %2086  ;;  %v526_v55 = vadd.f32 1e-05, %v494_v10 }
 0x33d   :  { %v668_v56 = vmul.f32 %v2087_v29, %v525_v27  ;;  %v662_v14 = vmul.f32 %v2085_v0, %v661_v12  ;;  %vm674_vm14 = vweird.f32 %v2087_v29  ;;  %v841_v12 = vmul.f32 %v2807_v49, %v2807_v49 }
 0x33e   :  { %2088 = vrsqrt.f32 %v526_v55  ;;  %vm675_vm0 = vmor %vm673_vm15, %vm674_vm14  ;;  %vm683_vm2 = vweird.f32 %v526_v55  ;;  %v2809_v50 = vpop.f32.mrf.mxu2 }
 0x33f   :  { %v669_v5 = vmul.f32 %v2087_v29, %v668_v56  ;;  %v666_v11 = vsel %vm665_vm13, %v2085_v0, %v662_v14  ;;  %v842_v10 = vmul.f32 %v2809_v50, %v2809_v50 }
 0x340   :  { %v700_v31 = vmul.f32 %v666_v11, %v508_v19 }
 0x341   :  { %v670_v32 = vmul.f32 0.5, %v669_v5 }
 0x342   :  { %v716_v6 = vmax.f32 %v700_v31, 0.0 }
 0x343   :  { %v671_v7 = vsub.f32 1.5, %v670_v32 }
 0x344   :  { %v2089_v13 = vpop.eup %2088  ;;  %v725_v38 = vpack.c.bf16 %v716_v6, %v715_v2 }
 0x345   :  { %v678_v59 = vmul.f32 %v2089_v13, %v526_v55  ;;  %v672_v26 = vmul.f32 %v2087_v29, %v671_v7  ;;  %vm684_vm1 = vweird.f32 %v2089_v13 }
 0x346   :  { %829 = vmatmul.bf16.gmra.mxu2 %v725_v38  ;;  %vm685_vm3 = vmor %vm683_vm2, %vm684_vm1  ;;  %v2811_v61 = vpop.f32.mrf.mxu2 }
 0x347   :  { %v679_v44 = vmul.f32 %v2089_v13, %v678_v59  ;;  %v676_v23 = vsel %vm675_vm0, %v2087_v29, %v672_v26  ;;  %v843_v28 = vmul.f32 %v2811_v61, %v2811_v61 }
 0x348   :  { %v701_v37 = vmul.f32 %v676_v23, %v509_v22 }
 0x349   :  { %v680_v43 = vmul.f32 0.5, %v679_v44  ;;  %v2188_v44 = vld [vmem:[%s3322_s3] sm:$0xf] }
 0x34a   :  { %v717_v48 = vmax.f32 %v701_v37, 0.0  ;;  %v2912_v26 = vperm.slane %v2188_v44, 2  ;;  %v2917_v23 = vperm.slane %v2188_v44, 3 }
 0x34b   :  { %v681_v60 = vsub.f32 1.5, %v680_v43 }
 0x34d   :  { %v682_v24 = vmul.f32 %v2089_v13, %v681_v60 }
 0x34f   :  { %v686_v39 = vsel %vm685_vm3, %v2089_v13, %v682_v24 }
 0x350   :  { %v702_v45 = vmul.f32 %v686_v39, %v510_v3 }
 0x352   :  { %v718_v47 = vmax.f32 %v702_v45, 0.0 }
 0x354   :  { %v726_v42 = vpack.c.bf16 %v718_v47, %v717_v48 }
 0x356   :  { %834 = vmatmul.bf16.gmra.mxu2 %v726_v42 }
 0x389   :  { %v2813_v1 = vpop.f32.mrf.mxu2 }
 0x38a   :  { %v844_v35 = vmul.f32 %v2813_v1, %v2813_v1 }
 0x391   :  { %v2815_v52 = vpop.f32.mrf.mxu2 }
 0x392   :  { %v845_v20 = vmul.f32 %v2815_v52, %v2815_v52 }
 0x399   :  { %v2817_v62 = vpop.f32.mrf.mxu2 }
 0x39a   :  { %v846_v8 = vmul.f32 %v2817_v62, %v2817_v62 }
 0x3a1   :  { %v2819_v21 = vpop.f32.mrf.mxu2 }
 0x3a2   :  { %v847_v4 = vmul.f32 %v2819_v21, %v2819_v21 }
 0x3a9   :  { %v2821_v18 = vpop.f32.mrf.mxu2 }
 0x3aa   :  { %v848_v25 = vmul.f32 %v2821_v18, %v2821_v18 }
 0x3b1   :  { %v2823_v16 = vpop.f32.mrf.mxu2 }
 0x3b2   :  { %v849_v63 = vmul.f32 %v2823_v16, %v2823_v16 }
 0x3b9   :  { %v2825_v36 = vpop.f32.mrf.mxu2 }
 0x3ba   :  { %v850_v46 = vmul.f32 %v2825_v36, %v2825_v36 }
 0x3c1   :  { %v2827_v53 = vpop.f32.mrf.mxu2 }
 0x3c2   :  { %v851_v34 = vmul.f32 %v2827_v53, %v2827_v53 }
 0x3c9   :  { %v2829_v57 = vpop.f32.mrf.mxu2 }
 0x3ca   :  { %v852_v27 = vmul.f32 %v2829_v57, %v2829_v57 }
 0x3d1   :  { %v2831_v9 = vpop.f32.mrf.mxu2 }
 0x3d2   :  { %v853_v0 = vmul.f32 %v2831_v9, %v2831_v9 }
 0x3d9   :  { %v2833_v58 = vpop.f32.mrf.mxu2 }
 0x3da   :  { %v854_v33 = vmul.f32 %v2833_v58, %v2833_v58 }
 0x3e1   :  { %v2835_v51 = vpop.f32.mrf.mxu2 }
 0x3e2   :  { %v855_v54 = vmul.f32 %v2835_v51, %v2835_v51  ;;  %856 = vmatpush.msrb.mxu1 %v2835_v51 }
 0x3e4   :  { %857 = vmatpush.msrb.mxu1 %v2833_v58  ;;  %877 = vmatpush.msra.mxu3 %v855_v54 }
 0x3e6   :  { %858 = vmatpush.msrb.mxu1 %v2831_v9  ;;  %878 = vmatpush.msra.mxu3 %v854_v33 }
 0x3e8   :  { %859 = vmatpush.msrb.mxu1 %v2829_v57  ;;  %879 = vmatpush.msra.mxu3 %v853_v0 }
 0x3ea   :  { %860 = vmatpush.msrb.mxu1 %v2827_v53  ;;  %880 = vmatpush.msra.mxu3 %v852_v27 }
 0x3ec   :  { %861 = vmatpush.msrb.mxu1 %v2825_v36  ;;  %881 = vmatpush.msra.mxu3 %v851_v34 }
 0x3ee   :  { %862 = vmatpush.msrb.mxu1 %v2823_v16  ;;  %882 = vmatpush.msra.mxu3 %v850_v46 }
 0x3f0   :  { %863 = vmatpush.msrb.mxu1 %v2821_v18  ;;  %883 = vmatpush.msra.mxu3 %v849_v63 }
 0x3f2   :  { %864 = vmatpush.msrb.mxu1 %v2819_v21  ;;  %884 = vmatpush.msra.mxu3 %v848_v25 }
 0x3f4   :  { %865 = vmatpush.msrb.mxu1 %v2817_v62  ;;  %885 = vmatpush.msra.mxu3 %v847_v4 }
 0x3f6   :  { %866 = vmatpush.msrb.mxu1 %v2815_v52  ;;  %886 = vmatpush.msra.mxu3 %v846_v8 }
 0x3f8   :  { %867 = vmatpush.msrb.mxu1 %v2813_v1  ;;  %887 = vmatpush.msra.mxu3 %v845_v20 }
 0x3fa   :  { %868 = vmatpush.msrb.mxu1 %v2811_v61  ;;  %888 = vmatpush.msra.mxu3 %v844_v35 }
 0x3fc   :  { %869 = vmatpush.msrb.mxu1 %v2809_v50  ;;  %889 = vmatpush.msra.mxu3 %v843_v28 }
 0x3fe   :  { %870 = vmatpush.msrb.mxu1 %v2807_v49  ;;  %890 = vmatpush.msra.mxu3 %v842_v10 }
 0x400   :  { %871 = vmatpush.msrb.mxu1 %v2805_v40  ;;  %891 = vmatpush.msra.mxu3 %v841_v12 }
 0x401   :  { %872 = vmatmul.f32.vlgmr.msrb.gmra.mxu1 %v2215_v41 }
 0x402   :  { %892 = vmatpush.msra.mxu3 %v840_v15  ;;  %2035 = vmatpush.msra.mxu1 %v2215_v41 }
 0x403   :  { %893 = vmatmul.f32.vlgmr.msra.gmra.mxu3 %v2215_v41 }
 0x404   :  { %2036 = vmatpush.msra.mxu1 %v2215_v41 }
 0x406   :  { %2037 = vmatpush.msra.mxu1 %v2215_v41 }
 0x408   :  { %2038 = vmatpush.msra.mxu1 %v2215_v41 }
 0x40a   :  { %2039 = vmatpush.msra.mxu1 %v2215_v41 }
 0x40c   :  { %2040 = vmatpush.msra.mxu1 %v2215_v41 }
 0x40e   :  { %2041 = vmatpush.msra.mxu1 %v2215_v41 }
 0x410   :  { %2042 = vmatpush.msra.mxu1 %v2215_v41 }
 0x412   :  { %2043 = vmatpush.msra.mxu1 %v2215_v41 }
 0x414   :  { %2044 = vmatpush.msra.mxu1 %v2215_v41 }
 0x416   :  { %2045 = vmatpush.msra.mxu1 %v2215_v41 }
 0x418   :  { %2046 = vmatpush.msra.mxu1 %v2215_v41 }
 0x41a   :  { %2047 = vmatpush.msra.mxu1 %v2215_v41 }
 0x41c   :  { %2048 = vmatpush.msra.mxu1 %v2215_v41 }
 0x41e   :  { %2049 = vmatpush.msra.mxu1 %v2215_v41 }
 0x420   :  { %2050 = vmatpush.msra.mxu1 %v2215_v41 }
 0x47e   :  { %v873_v29 = vpop.f32.mrf.mxu1 }
 0x47f   :  { %v876_v17 = vmul.f32 0.0078125, %v873_v29 }
 0x481   :  { %v898_v55 = vmul.f32 %v876_v17, %v876_v17  ;;  %v2903_v7 = vperm.slane %v876_v17, 0 }
 0x483   :  { %v902_v59 = vsub.f32 %v2805_v40, %v2903_v7  ;;  %v903_v43 = vsub.f32 %v2807_v49, %v2903_v7  ;;  %v904_v24 = vsub.f32 %v2809_v50, %v2903_v7  ;;  %v905_v47 = vsub.f32 %v2811_v61, %v2903_v7 }
 0x484   :  { %v911_v42 = vsub.f32 %v2823_v16, %v2903_v7  ;;  %v912_v50 = vsub.f32 %v2825_v36, %v2903_v7  ;;  %v913_v54 = vsub.f32 %v2827_v53, %v2903_v7  ;;  %v914_v33 = vsub.f32 %v2829_v57, %v2903_v7 }
 0x485   :  { %v915_v61 = vsub.f32 %v2831_v9, %v2903_v7  ;;  %v916_v16 = vsub.f32 %v2833_v58, %v2903_v7  ;;  %v917_v0 = vsub.f32 %v2835_v51, %v2903_v7 }
 0x486   :  { %v894_v56 = vpop.f32.mrf.mxu3 }
 0x487   :  { %v897_v14 = vmul.f32 0.0078125, %v894_v56 }
 0x489   :  { %v899_v19 = vsub.f32 %v897_v14, %v898_v55 }
 0x48b   :  { %v900_v30 = vmax.f32 %v899_v19, 0.0 }
 0x48d   :  { %v918_v5 = vadd.f32 0.001, %v900_v30  ;;  %v906_v30 = vsub.f32 %v2813_v1, %v2903_v7 }
 0x48f   :  { %2090 = vrsqrt.f32 %v918_v5  ;;  %vm925_vm5 = vweird.f32 %v918_v5 }
 0x495   :  { %v2091_v11 = vpop.eup %2090 }
 0x496   :  { %v920_v31 = vmul.f32 %v2091_v11, %v918_v5  ;;  %vm926_vm4 = vweird.f32 %v2091_v11 }
 0x497   :  { %vm927_vm6 = vmor %vm925_vm5, %vm926_vm4 }
 0x498   :  { %v921_v32 = vmul.f32 %v2091_v11, %v920_v31 }
 0x49a   :  { %v922_v2 = vmul.f32 0.5, %v921_v32 }
 0x49c   :  { %v923_v6 = vsub.f32 1.5, %v922_v2  ;;  %v907_v2 = vsub.f32 %v2815_v52, %v2903_v7 }
 0x49e   :  { %v924_v13 = vmul.f32 %v2091_v11, %v923_v6 }
 0x4a0   :  { %v928_v41 = vsel %vm927_vm6, %v2091_v11, %v924_v13 }
 0x4a1   :  { %v2905_v38 = vperm.slane %v928_v41, 0 }
 0x4a3   :  { %v930_v60 = vmul.f32 %v2905_v38, %v902_v59  ;;  %v931_v22 = vmul.f32 %v2905_v38, %v903_v43  ;;  %v932_v39 = vmul.f32 %v2905_v38, %v904_v24  ;;  %v933_v27 = vmul.f32 %v2905_v38, %v905_v47 }
 0x4a4   :  { %v939_v36 = vmul.f32 %v2905_v38, %v911_v42  ;;  %v940_v34 = vmul.f32 %v2905_v38, %v912_v50  ;;  %v941_v53 = vmul.f32 %v2905_v38, %v913_v54  ;;  %v942_v57 = vmul.f32 %v2905_v38, %v914_v33 }
 0x4a5   :  { %v947_v3 = vmul.f32 %v2912_v26, %v930_v60  ;;  %v948_v37 = vmul.f32 %v2912_v26, %v931_v22  ;;  %v949_v49 = vmul.f32 %v2912_v26, %v932_v39  ;;  %v943_v46 = vmul.f32 %v2905_v38, %v915_v61 }
 0x4a6   :  { %v944_v9 = vmul.f32 %v2905_v38, %v916_v16  ;;  %v945_v58 = vmul.f32 %v2905_v38, %v917_v0  ;;  %v956_v51 = vmul.f32 %v2912_v26, %v939_v36  ;;  %v957_v25 = vmul.f32 %v2912_v26, %v940_v34 }
 0x4a7   :  { %v2926_v45 = vadd.f32 %v2917_v23, %v947_v3  ;;  %v2929_v48 = vadd.f32 %v2917_v23, %v948_v37  ;;  %v2960_v63 = vadd.f32 %v2917_v23, %v949_v49  ;;  %v958_v4 = vmul.f32 %v2912_v26, %v941_v53 }
 0x4a8   :  { %v959_v8 = vmul.f32 %v2912_v26, %v942_v57  ;;  %v960_v20 = vmul.f32 %v2912_v26, %v943_v46  ;;  %v961_v35 = vmul.f32 %v2912_v26, %v944_v9  ;;  %v962_v28 = vmul.f32 %v2912_v26, %v945_v58 }
 0x4a9   :  { %1012 = vmatmul.f32.vlgmr.msrb.gmra.mxu0 %v2926_v45  ;;  %v981_v40 = vmul.f32 %v2929_v48, %v2929_v48  ;;  %v2970_v10 = vadd.f32 %v2917_v23, %v956_v51  ;;  %v2973_v12 = vadd.f32 %v2917_v23, %v957_v25  ;;  %v2976_v15 = vadd.f32 %v2917_v23, %v958_v4 }
 0x4aa   :  { %v2979_v29 = vadd.f32 %v2917_v23, %v959_v8  ;;  %v2982_v17 = vadd.f32 %v2917_v23, %v960_v20  ;;  %v2985_v55 = vadd.f32 %v2917_v23, %v961_v35  ;;  %v2988_v56 = vadd.f32 %v2917_v23, %v962_v28 }
 0x4ab   :  { %1096 = vmatmul.f32.vlgmr.msra.gmra.mxu1 %v981_v40  ;;  %v982_v14 = vmul.f32 %v2960_v63, %v2960_v63  ;;  %v950_v19 = vmul.f32 %v2912_v26, %v933_v27  ;;  %v934_v11 = vmul.f32 %v2905_v38, %v906_v30  ;;  %v935_v1 = vmul.f32 %v2905_v38, %v907_v2 }
 0x4ac   :  { %v908_v59 = vsub.f32 %v2817_v62, %v2903_v7  ;;  %v909_v22 = vsub.f32 %v2819_v21, %v2903_v7  ;;  %v910_v39 = vsub.f32 %v2821_v18, %v2903_v7  ;;  %v989_v7 = vmul.f32 %v2970_v10, %v2970_v10 }
 0x4ad   :  { %v2997_v5 = vadd.f32 %v2917_v23, %v950_v19  ;;  %v951_v32 = vmul.f32 %v2912_v26, %v934_v11  ;;  %v952_v41 = vmul.f32 %v2912_v26, %v935_v1  ;;  %v993_v50 = vmul.f32 %v2982_v17, %v2982_v17 }
 0x4ae   :  { %v936_v52 = vmul.f32 %v2905_v38, %v908_v59  ;;  %v937_v62 = vmul.f32 %v2905_v38, %v909_v22  ;;  %v938_v21 = vmul.f32 %v2905_v38, %v910_v39  ;;  %v990_v38 = vmul.f32 %v2973_v12, %v2973_v12 }
 0x4af   :  { %v983_v31 = vmul.f32 %v2997_v5, %v2997_v5  ;;  %v3007_v6 = vadd.f32 %v2917_v23, %v951_v32  ;;  %v3017_v44 = vadd.f32 %v2917_v23, %v952_v41  ;;  %v994_v54 = vmul.f32 %v2985_v55, %v2985_v55 }
 0x4b0   :  { %v953_v60 = vmul.f32 %v2912_v26, %v936_v52  ;;  %v954_v37 = vmul.f32 %v2912_v26, %v937_v62  ;;  %v955_v40 = vmul.f32 %v2912_v26, %v938_v21  ;;  %v991_v26 = vmul.f32 %v2976_v15, %v2976_v15 }
 0x4b1   :  { %1015 = vmatmul.f32.gmra.mxu0 %v2929_v48  ;;  %v984_v13 = vmul.f32 %v3007_v6, %v3007_v6  ;;  %v985_v43 = vmul.f32 %v3017_v44, %v3017_v44  ;;  %v995_v33 = vmul.f32 %v2988_v56, %v2988_v56  ;;  %v980_v16 = vmul.f32 %v2926_v45, %v2926_v45 }
 0x4b2   :  { %v3027_v24 = vadd.f32 %v2917_v23, %v953_v60  ;;  %v3037_v47 = vadd.f32 %v2917_v23, %v954_v37  ;;  %v3045_v49 = vadd.f32 %v2917_v23, %v955_v40  ;;  %v992_v23 = vmul.f32 %v2979_v29, %v2979_v29 }
 0x4b3   :  { %1099 = vmatmul.f32.gmra.mxu1 %v982_v14 }
 0x4b4   :  { %v986_v3 = vmul.f32 %v3027_v24, %v3027_v24  ;;  %v987_v42 = vmul.f32 %v3037_v47, %v3037_v47  ;;  %v988_v18 = vmul.f32 %v3045_v49, %v3045_v49 }
 0x4b9   :  { %1018 = vmatmul.f32.gmra.mxu0 %v2960_v63 }
 0x4bb   :  { %1102 = vmatmul.f32.gmra.mxu1 %v983_v31 }
 0x4c1   :  { %1021 = vmatmul.f32.gmra.mxu0 %v2997_v5 }
 0x4c3   :  { %1105 = vmatmul.f32.gmra.mxu1 %v984_v13 }
 0x4c9   :  { %1024 = vmatmul.f32.gmra.mxu0 %v3007_v6 }
 0x4cb   :  { %1108 = vmatmul.f32.gmra.mxu1 %v985_v43 }
 0x4d1   :  { %1027 = vmatmul.f32.gmra.mxu0 %v3017_v44 }
 0x4d3   :  { %1111 = vmatmul.f32.gmra.mxu1 %v986_v3 }
 0x4d9   :  { %1030 = vmatmul.f32.gmra.mxu0 %v3027_v24 }
 0x4db   :  { %1114 = vmatmul.f32.gmra.mxu1 %v987_v42 }
 0x4e1   :  { %1033 = vmatmul.f32.gmra.mxu0 %v3037_v47 }
 0x4e3   :  { %1117 = vmatmul.f32.gmra.mxu1 %v988_v18 }
 0x4e9   :  { %1036 = vmatmul.f32.gmra.mxu0 %v3045_v49 }
 0x4eb   :  { %1120 = vmatmul.f32.gmra.mxu1 %v989_v7 }
 0x4f1   :  { %1039 = vmatmul.f32.gmra.mxu0 %v2970_v10 }
 0x4f3   :  { %1123 = vmatmul.f32.gmra.mxu1 %v990_v38 }
 0x4f9   :  { %1042 = vmatmul.f32.gmra.mxu0 %v2973_v12 }
 0x4fb   :  { %1126 = vmatmul.f32.gmra.mxu1 %v991_v26 }
 0x501   :  { %1045 = vmatmul.f32.gmra.mxu0 %v2976_v15 }
 0x503   :  { %1129 = vmatmul.f32.gmra.mxu1 %v992_v23 }
 0x509   :  { %1048 = vmatmul.f32.gmra.mxu0 %v2979_v29 }
 0x50b   :  { %1132 = vmatmul.f32.gmra.mxu1 %v993_v50 }
 0x511   :  { %1051 = vmatmul.f32.gmra.mxu0 %v2982_v17 }
 0x513   :  { %1135 = vmatmul.f32.gmra.mxu1 %v994_v54 }
 0x519   :  { %1054 = vmatmul.f32.gmra.mxu0 %v2985_v55 }
 0x51b   :  { %1138 = vmatmul.f32.gmra.mxu1 %v995_v33 }
 0x521   :  { %1057 = vmatmul.f32.gmra.mxu0 %v2988_v56 }
 0x526   :  { %v3072_v61 = vpop.f32.mrf.mxu0 }
 0x528   :  { %v3076_v0 = vpop.f32.mrf.mxu1 }
 0x529   :  { %1093 = vmatmul.f32.vlgmr.msra.gmra.mxu0 %v980_v16 }
 0x52e   :  { %v3078_v27 = vpop.f32.mrf.mxu0 }
 0x530   :  { %v1100_v36 = vpop.f32.mrf.mxu1 }
 0x531   :  { %v1144_v46 = vmul.f32 0.015625, %v1100_v36 }
 0x536   :  { %v1019_v34 = vpop.f32.mrf.mxu0 }
 0x537   :  { %v3080_v53 = vmul.f32 0.015625, %v1019_v34 }
 0x538   :  { %v1103_v57 = vpop.f32.mrf.mxu1 }
 0x539   :  { %v1160_v9 = vmul.f32 %v3080_v53, %v3080_v53  ;;  %v1145_v35 = vmul.f32 0.015625, %v1103_v57  ;;  %v1208_v57 = vsub.f32 %v2960_v63, %v3080_v53 }
 0x53b   :  { %v1176_v58 = vsub.f32 %v1144_v46, %v1160_v9 }
 0x53d   :  { %v1192_v51 = vmax.f32 %v1176_v58, 0.0 }
 0x53e   :  { %v1022_v25 = vpop.f32.mrf.mxu0 }
 0x53f   :  { %v1224_v4 = vadd.f32 1e-05, %v1192_v51  ;;  %v1064_v8 = vmul.f32 0.015625, %v1022_v25 }
 0x540   :  { %v1106_v20 = vpop.f32.mrf.mxu1 }
 0x541   :  { %2092 = vrsqrt.f32 %v1224_v4  ;;  %v1161_v28 = vmul.f32 %v1064_v8, %v1064_v8  ;;  %v1146_v13 = vmul.f32 0.015625, %v1106_v20  ;;  %vm1264_vm8 = vweird.f32 %v1224_v4 }
 0x542   :  { %v1209_v58 = vsub.f32 %v2997_v5, %v1064_v8 }
 0x543   :  { %v1177_v14 = vsub.f32 %v1145_v35, %v1161_v28 }
 0x545   :  { %v1193_v19 = vmax.f32 %v1177_v14, 0.0 }
 0x546   :  { %v1025_v30 = vpop.f32.mrf.mxu0 }
 0x547   :  { %v2093_v11 = vpop.eup %2092  ;;  %v1225_v31 = vadd.f32 1e-05, %v1193_v19  ;;  %v3084_v32 = vmul.f32 0.015625, %v1025_v30 }
 0x548   :  { %v1259_v2 = vmul.f32 %v2093_v11, %v1224_v4  ;;  %v1109_v1 = vpop.f32.mrf.mxu1  ;;  %vm1265_vm7 = vweird.f32 %v2093_v11 }
 0x549   :  { %2094 = vrsqrt.f32 %v1225_v31  ;;  %v1162_v41 = vmul.f32 %v3084_v32, %v3084_v32  ;;  %v1147_v40 = vmul.f32 0.015625, %v1109_v1  ;;  %vm3092_vm9 = vmor %vm1264_vm8, %vm1265_vm7  ;;  %vm1274_vm11 = vweird.f32 %v1225_v31 }
 0x54a   :  { %v1260_v59 = vmul.f32 %v2093_v11, %v1259_v2 }
 0x54b   :  { %v1178_v52 = vsub.f32 %v1146_v13, %v1162_v41 }
 0x54c   :  { %v1261_v43 = vmul.f32 0.5, %v1260_v59 }
 0x54d   :  { %v1194_v60 = vmax.f32 %v1178_v52, 0.0 }
 0x54e   :  { %v1028_v22 = vpop.f32.mrf.mxu0  ;;  %v1262_v62 = vsub.f32 1.5, %v1261_v43 }
 0x54f   :  { %v2095_v3 = vpop.eup %2094  ;;  %v1226_v37 = vadd.f32 1e-05, %v1194_v60  ;;  %v3088_v39 = vmul.f32 0.015625, %v1028_v22 }
 0x550   :  { %v1269_v21 = vmul.f32 %v2095_v3, %v1225_v31  ;;  %v1112_v42 = vpop.f32.mrf.mxu1  ;;  %v1263_v38 = vmul.f32 %v2093_v11, %v1262_v62  ;;  %vm1275_vm10 = vweird.f32 %v2095_v3 }
 0x551   :  { %2096 = vrsqrt.f32 %v1226_v37  ;;  %v1163_v18 = vmul.f32 %v3088_v39, %v3088_v39  ;;  %v1148_v20 = vmul.f32 0.015625, %v1112_v42  ;;  %vm1276_vm12 = vmor %vm1274_vm11, %vm1275_vm10  ;;  %vm1284_vm14 = vweird.f32 %v1226_v37 }
 0x552   :  { %v1270_v7 = vmul.f32 %v2095_v3, %v1269_v21  ;;  %v1267_v16 = vsel %vm3092_vm9, %v2093_v11, %v1263_v38 }
 0x553   :  { %v1179_v26 = vsub.f32 %v1147_v40, %v1163_v18  ;;  %v1400_v28 = vmul.f32 %v1267_v16, %v1208_v57 }
 0x554   :  { %v1271_v23 = vmul.f32 0.5, %v1270_v7 }
 0x555   :  { %v1195_v50 = vmax.f32 %v1179_v26, 0.0  ;;  %v1416_v2 = vmax.f32 %v1400_v28, 0.0 }
 0x556   :  { %v1031_v33 = vpop.f32.mrf.mxu0  ;;  %v1272_v36 = vsub.f32 1.5, %v1271_v23 }
 0x557   :  { %v2097_v34 = vpop.eup %2096  ;;  %v1227_v46 = vadd.f32 1e-05, %v1195_v50  ;;  %v3100_v9 = vmul.f32 0.015625, %v1031_v33  ;;  %v1210_v50 = vsub.f32 %v3007_v6, %v3084_v32 }
 0x558   :  { %v1279_v51 = vmul.f32 %v2097_v34, %v1226_v37  ;;  %v1115_v25 = vpop.f32.mrf.mxu1  ;;  %v1273_v4 = vmul.f32 %v2095_v3, %v1272_v36  ;;  %vm1285_vm13 = vweird.f32 %v2097_v34  ;;  %v1211_v37 = vsub.f32 %v3017_v44, %v3088_v39 }
 0x559   :  { %2098 = vrsqrt.f32 %v1227_v46  ;;  %v1164_v35 = vmul.f32 %v3100_v9, %v3100_v9  ;;  %v1149_v60 = vmul.f32 0.015625, %v1115_v25  ;;  %vm3111_vm15 = vmor %vm1284_vm14, %vm1285_vm13  ;;  %vm1294_vm1 = vweird.f32 %v1227_v46 }
 0x55a   :  { %v1280_v14 = vmul.f32 %v2097_v34, %v1279_v51  ;;  %v1277_v19 = vsel %vm1276_vm12, %v2095_v3, %v1273_v4 }
 0x55b   :  { %v1180_v30 = vsub.f32 %v1148_v20, %v1164_v35  ;;  %v1401_v63 = vmul.f32 %v1277_v19, %v1209_v58 }
 0x55c   :  { %v1281_v53 = vmul.f32 0.5, %v1280_v14 }
 0x55d   :  { %v1196_v11 = vmax.f32 %v1180_v30, 0.0  ;;  %v1417_v1 = vmax.f32 %v1401_v63, 0.0 }
 0x55e   :  { %v1034_v5 = vpop.f32.mrf.mxu0  ;;  %v1282_v8 = vsub.f32 1.5, %v1281_v53 }
 0x55f   :  { %v2099_v13 = vpop.eup %2098  ;;  %v1228_v41 = vadd.f32 1e-05, %v1196_v11  ;;  %v3105_v31 = vmul.f32 0.015625, %v1034_v5  ;;  %v3107_v59 = vpack.c.bf16 %v1417_v1, %v1416_v2 }
 0x560   :  { %v1289_v52 = vmul.f32 %v2099_v13, %v1227_v46  ;;  %v1118_v43 = vpop.f32.mrf.mxu1  ;;  %v1283_v3 = vmul.f32 %v2097_v34, %v1282_v8  ;;  %vm1295_vm0 = vweird.f32 %v2099_v13 }
 0x561   :  { %2100 = vrsqrt.f32 %v1228_v41  ;;  %v1165_v22 = vmul.f32 %v3105_v31, %v3105_v31  ;;  %v1150_v58 = vmul.f32 0.015625, %v1118_v43  ;;  %vm1296_vm2 = vmor %vm1294_vm1, %vm1295_vm0  ;;  %vm1304_vm4 = vweird.f32 %v1228_v41 }
 0x562   :  { %v1290_v62 = vmul.f32 %v2099_v13, %v1289_v52  ;;  %v1287_v38 = vsel %vm3111_vm15, %v2097_v34, %v1283_v3 }
 0x563   :  { %v1181_v21 = vsub.f32 %v1149_v60, %v1165_v22  ;;  %v1402_v51 = vmul.f32 %v1287_v38, %v1210_v50 }
 0x564   :  { %v1291_v42 = vmul.f32 0.5, %v1290_v62 }
 0x565   :  { %v1197_v40 = vmax.f32 %v1181_v21, 0.0  ;;  %v1418_v28 = vmax.f32 %v1402_v51, 0.0 }
 0x566   :  { %v1037_v7 = vpop.f32.mrf.mxu0  ;;  %v1292_v26 = vsub.f32 1.5, %v1291_v42  ;;  %v1212_v42 = vsub.f32 %v3027_v24, %v3100_v9 }
 0x567   :  { %v2101_v23 = vpop.eup %2100  ;;  %v1229_v54 = vadd.f32 1e-05, %v1197_v40  ;;  %v3119_v33 = vmul.f32 0.015625, %v1037_v7 }
 0x568   :  { %v1299_v16 = vmul.f32 %v2101_v23, %v1228_v41  ;;  %v1121_v36 = vpop.f32.mrf.mxu1  ;;  %v1293_v57 = vmul.f32 %v2099_v13, %v1292_v26  ;;  %vm1305_vm3 = vweird.f32 %v2101_v23  ;;  %v1213_v41 = vsub.f32 %v3037_v47, %v3105_v31 }
 0x569   :  { %2102 = vrsqrt.f32 %v1229_v54  ;;  %v1166_v34 = vmul.f32 %v3119_v33, %v3119_v33  ;;  %v1151_v2 = vmul.f32 0.015625, %v1121_v36  ;;  %vm3131_vm5 = vmor %vm1304_vm4, %vm1305_vm3  ;;  %vm1314_vm7 = vweird.f32 %v1229_v54 }
 0x56a   :  { %v1300_v25 = vmul.f32 %v2101_v23, %v1299_v16  ;;  %v1297_v4 = vsel %vm1296_vm2, %v2099_v13, %v1293_v57 }
 0x56b   :  { %v1182_v6 = vsub.f32 %v1150_v58, %v1166_v34  ;;  %v1403_v32 = vmul.f32 %v1297_v4, %v1211_v37 }
 0x56c   :  { %v1301_v20 = vmul.f32 0.5, %v1300_v25 }
 0x56d   :  { %v1198_v35 = vmax.f32 %v1182_v6, 0.0  ;;  %v1419_v14 = vmax.f32 %v1403_v32, 0.0 }
 0x56e   :  { %v1040_v44 = vpop.f32.mrf.mxu0  ;;  %v1302_v39 = vsub.f32 1.5, %v1301_v20 }
 0x56f   :  { %v2103_v19 = vpop.eup %2102  ;;  %v1230_v30 = vadd.f32 1e-05, %v1198_v35  ;;  %v3125_v46 = vmul.f32 0.015625, %v1040_v44  ;;  %v3127_v63 = vpack.c.bf16 %v1419_v14, %v1418_v28 }
 0x570   :  { %v1309_v53 = vmul.f32 %v2103_v19, %v1229_v54  ;;  %v1124_v11 = vpop.f32.mrf.mxu1  ;;  %v1303_v8 = vmul.f32 %v2101_v23, %v1302_v39  ;;  %vm1315_vm6 = vweird.f32 %v2103_v19 }
 0x571   :  { %2104 = vrsqrt.f32 %v1230_v30  ;;  %v1167_v1 = vmul.f32 %v3125_v46, %v3125_v46  ;;  %v1152_v50 = vmul.f32 0.015625, %v1124_v11  ;;  %vm1316_vm8 = vmor %vm1314_vm7, %vm1315_vm6  ;;  %vm1324_vm10 = vweird.f32 %v1230_v30 }
 0x572   :  { %v1310_v5 = vmul.f32 %v2103_v19, %v1309_v53  ;;  %v1307_v62 = vsel %vm3131_vm5, %v2101_v23, %v1303_v8  ;;  %v1215_v60 = vsub.f32 %v2970_v10, %v3125_v46 }
 0x573   :  { %v1183_v13 = vsub.f32 %v1151_v2, %v1167_v1  ;;  %v1404_v37 = vmul.f32 %v1307_v62, %v1212_v42  ;;  %v2018_v2 = vld [vmem:[%s3321_s2 + $0x78] sm:$0xff] }
 0x574   :  { %v1311_v52 = vmul.f32 0.5, %v1310_v5  ;;  %1507 = vmatpush.bf16.msrb.mxu2 %v2018_v2 }
 0x575   :  { %v1199_v43 = vmax.f32 %v1183_v13, 0.0  ;;  %v1420_v34 = vmax.f32 %v1404_v37, 0.0 }
 0x576   :  { %v1043_v22 = vpop.f32.mrf.mxu0  ;;  %v1312_v3 = vsub.f32 1.5, %v1311_v52 }
 0x577   :  { %v2105_v21 = vpop.eup %2104  ;;  %v1231_v40 = vadd.f32 1e-05, %v1199_v43  ;;  %v3139_v18 = vmul.f32 0.015625, %v1043_v22 }
 0x578   :  { %v1319_v7 = vmul.f32 %v2105_v21, %v1230_v30  ;;  %v1127_v38 = vpop.f32.mrf.mxu1  ;;  %v1313_v26 = vmul.f32 %v2103_v19, %v1312_v3  ;;  %vm1325_vm9 = vweird.f32 %v2105_v21  ;;  %v1214_v30 = vsub.f32 %v3045_v49, %v3119_v33 }
 0x579   :  { %2106 = vrsqrt.f32 %v1231_v40  ;;  %v1168_v23 = vmul.f32 %v3139_v18, %v3139_v18  ;;  %v1153_v35 = vmul.f32 0.015625, %v1127_v38  ;;  %vm3154_vm11 = vmor %vm1324_vm10, %vm1325_vm9  ;;  %vm1334_vm13 = vweird.f32 %v1231_v40 }
 0x57a   :  { %v1320_v16 = vmul.f32 %v2105_v21, %v1319_v7  ;;  %v1317_v36 = vsel %vm1316_vm8, %v2103_v19, %v1313_v26  ;;  %v3177_v7 = vmul.f32 0.015625, %v3078_v27 }
 0x57b   :  { %v1184_v24 = vsub.f32 %v1152_v50, %v1168_v23  ;;  %v1405_v9 = vmul.f32 %v1317_v36, %v1213_v41 }
 0x57c   :  { %v1321_v57 = vmul.f32 0.5, %v1320_v16  ;;  %v1159_v36 = vmul.f32 %v3177_v7, %v3177_v7 }
 0x57d   :  { %v1200_v58 = vmax.f32 %v1184_v24, 0.0  ;;  %v1421_v51 = vmax.f32 %v1405_v9, 0.0 }
 0x57e   :  { %v1322_v47 = vsub.f32 1.5, %v1321_v57  ;;  %v1046_v31 = vpop.f32.mrf.mxu0 }
 0x57f   :  { %v2107_v25 = vpop.eup %2106  ;;  %v3145_v4 = vadd.f32 1e-05, %v1200_v58  ;;  %v3147_v54 = vmul.f32 0.015625, %v1046_v31  ;;  %v3149_v6 = vpack.c.bf16 %v1421_v51, %v1420_v34  ;;  %v1143_v58 = vmul.f32 0.015625, %v3076_v0 }
 0x580   :  { %v1329_v32 = vmul.f32 %v2107_v25, %v1231_v40  ;;  %v1130_v20 = vpop.f32.mrf.mxu1  ;;  %v1323_v14 = vmul.f32 %v2105_v21, %v1322_v47  ;;  %vm1335_vm12 = vweird.f32 %v2107_v25 }
 0x581   :  { %2108 = vrsqrt.f32 %v3145_v4  ;;  %v1169_v28 = vmul.f32 %v3147_v54, %v3147_v54  ;;  %vm1336_vm14 = vmor %vm1334_vm13, %vm1335_vm12  ;;  %vm1344_vm0 = vweird.f32 %v3145_v4 }
 0x582   :  { %v1330_v44 = vmul.f32 %v2107_v25, %v1329_v32  ;;  %v1327_v1 = vsel %vm3154_vm11, %v2105_v21, %v1323_v14  ;;  %v1154_v21 = vmul.f32 0.015625, %v1130_v20  ;;  %v2017_v20 = vld [vmem:[%s3321_s2 + $0x70] sm:$0xff] }
 0x583   :  { %v1185_v39 = vsub.f32 %v1153_v35, %v1169_v28  ;;  %v1406_v3 = vmul.f32 %v1327_v1, %v1214_v30  ;;  %1508 = vmatpush.bf16.msrb.mxu2 %v2017_v20 }
 0x584   :  { %v1331_v19 = vmul.f32 0.5, %v1330_v44 }
 0x585   :  { %v1201_v11 = vmax.f32 %v1185_v39, 0.0  ;;  %v1422_v38 = vmax.f32 %v1406_v3, 0.0 }
 0x586   :  { %v1332_v5 = vsub.f32 1.5, %v1331_v19  ;;  %v1049_v8 = vpop.f32.mrf.mxu0 }
 0x587   :  { %v3163_v13 = vpop.eup %2108  ;;  %v1233_v52 = vadd.f32 1e-05, %v1201_v11  ;;  %v3167_v43 = vmul.f32 0.015625, %v1049_v8  ;;  %v1217_v8 = vsub.f32 %v2976_v15, %v3147_v54 }
 0x588   :  { %v1333_v22 = vmul.f32 %v2107_v25, %v1332_v5  ;;  %v1339_v62 = vmul.f32 %v3163_v13, %v3145_v4  ;;  %v1133_v41 = vpop.f32.mrf.mxu1  ;;  %vm1345_vm15 = vweird.f32 %v3163_v13  ;;  %v1216_v4 = vsub.f32 %v2973_v12, %v3139_v18  ;;  %v2016_v5 = vld [vmem:[%s3321_s2 + $0x68] sm:$0xff] }
 0x589   :  { %2110 = vrsqrt.f32 %v1233_v52  ;;  %v1170_v42 = vmul.f32 %v3167_v43, %v3167_v43  ;;  %v1155_v34 = vmul.f32 0.015625, %v1133_v41  ;;  %vm3197_vm1 = vmor %vm1344_vm0, %vm1345_vm15  ;;  %vm1354_vm3 = vweird.f32 %v1233_v52  ;;  %1509 = vmatpush.bf16.msrb.mxu2 %v2016_v5  ;;  %v2014_v41 = vld [vmem:[%s3321_s2 + $0x58] sm:$0xff] }
 0x58a   :  { %v1337_v49 = vsel %vm1336_vm14, %v2107_v25, %v1333_v22  ;;  %v1340_v33 = vmul.f32 %v3163_v13, %v1339_v62  ;;  %v1175_v25 = vsub.f32 %v1143_v58, %v1159_v36 }
 0x58b   :  { %v1407_v10 = vmul.f32 %v1337_v49, %v1215_v60  ;;  %v1186_v46 = vsub.f32 %v1154_v21, %v1170_v42 }
 0x58c   :  { %v1341_v40 = vmul.f32 0.5, %v1340_v33  ;;  %v1191_v11 = vmax.f32 %v1175_v25, 0.0 }
 0x58d   :  { %v1423_v26 = vmax.f32 %v1407_v10, 0.0  ;;  %v1202_v50 = vmax.f32 %v1186_v46, 0.0 }
 0x58e   :  { %v1342_v23 = vsub.f32 1.5, %v1341_v40  ;;  %v1052_v37 = vpop.f32.mrf.mxu0  ;;  %v3223_v3 = vadd.f32 1e-05, %v1191_v11 }
 0x58f   :  { %v2111_v16 = vpop.eup %2110  ;;  %v3181_v24 = vadd.f32 1e-05, %v1202_v50  ;;  %v3183_v9 = vmul.f32 0.015625, %v1052_v37  ;;  %v3185_v57 = vpack.c.bf16 %v1423_v26, %v1422_v38 }
 0x590   :  { %v1349_v27 = vmul.f32 %v2111_v16, %v1233_v52  ;;  %v1343_v47 = vmul.f32 %v3163_v13, %v1342_v23  ;;  %v1136_v35 = vpop.f32.mrf.mxu1  ;;  %vm1355_vm2 = vweird.f32 %v2111_v16  ;;  %v2015_v52 = vld [vmem:[%s3321_s2 + $0x60] sm:$0xff] }
 0x591   :  { %2112 = vrsqrt.f32 %v3181_v24  ;;  %v1171_v51 = vmul.f32 %v3183_v9, %v3183_v9  ;;  %vm1356_vm4 = vmor %vm1354_vm3, %vm1355_vm2  ;;  %v1156_v12 = vmul.f32 0.015625, %v1136_v35  ;;  %1510 = vmatpush.bf16.msrb.mxu2 %v2015_v52  ;;  %vm1364_vm6 = vweird.f32 %v3181_v24 }
 0x592   :  { %v1350_v31 = vmul.f32 %v2111_v16, %v1349_v27  ;;  %v1347_v44 = vsel %vm3197_vm1, %v3163_v13, %v1343_v47  ;;  %v2013_v27 = vld [vmem:[%s3321_s2 + $0x50] sm:$0xff]  ;;  %vm1254_vm2 = vweird.f32 %v3223_v3 }
 0x593   :  { %v1187_v32 = vsub.f32 %v1155_v34, %v1171_v51  ;;  %v1408_v60 = vmul.f32 %v1347_v44, %v1216_v4  ;;  %v3248_v51 = vmul.f32 0.015625, %v3072_v61  ;;  %v1218_v44 = vsub.f32 %v2979_v29, %v3167_v43  ;;  %v2011_v29 = vld [vmem:[%s3321_s2 + $0x40] sm:$0xff] }
 0x594   :  { %v1351_v0 = vmul.f32 0.5, %v1350_v31 }
 0x595   :  { %v1203_v14 = vmax.f32 %v1187_v32, 0.0  ;;  %v1424_v42 = vmax.f32 %v1408_v60, 0.0  ;;  %1511 = vmatpush.bf16.msrb.mxu2 %v2014_v41 }
 0x596   :  { %v1352_v39 = vsub.f32 1.5, %v1351_v0  ;;  %v1055_v19 = vpop.f32.mrf.mxu0  ;;  %v2012_v0 = vld [vmem:[%s3321_s2 + $0x48] sm:$0xff] }
 0x597   :  { %v3204_v53 = vpop.eup %2112  ;;  %v3208_v2 = vadd.f32 1e-05, %v1203_v14  ;;  %v3210_v1 = vmul.f32 0.015625, %v1055_v19  ;;  %v1158_v14 = vmul.f32 %v3248_v51, %v3248_v51 }
 0x598   :  { %v1353_v13 = vmul.f32 %v2111_v16, %v1352_v39  ;;  %v1359_v30 = vmul.f32 %v3204_v53, %v3181_v24  ;;  %v1139_v46 = vpop.f32.mrf.mxu1  ;;  %vm1365_vm5 = vweird.f32 %v3204_v53 }
 0x599   :  { %2114 = vrsqrt.f32 %v3208_v2  ;;  %v1172_v18 = vmul.f32 %v3210_v1, %v3210_v1  ;;  %vm3253_vm7 = vmor %vm1364_vm6, %vm1365_vm5  ;;  %1512 = vmatpush.bf16.msrb.mxu2 %v2013_v27  ;;  %vm1374_vm9 = vweird.f32 %v3208_v2 }
 0x59a   :  { %v1357_v22 = vsel %vm1356_vm4, %v2111_v16, %v1353_v13  ;;  %v1360_v62 = vmul.f32 %v3204_v53, %v1359_v30  ;;  %2116 = vrsqrt.f32 %v3223_v3  ;;  %v1157_v16 = vmul.f32 0.015625, %v1139_v46 }
 0x59b   :  { %v1409_v15 = vmul.f32 %v1357_v22, %v1217_v8  ;;  %v1188_v54 = vsub.f32 %v1156_v12, %v1172_v18  ;;  %v1219_v8 = vsub.f32 %v2982_v17, %v3183_v9 }
 0x59c   :  { %v1361_v21 = vmul.f32 0.5, %v1360_v62 }
 0x59d   :  { %v1425_v49 = vmax.f32 %v1409_v15, 0.0  ;;  %v1204_v33 = vmax.f32 %v1188_v54, 0.0  ;;  %1513 = vmatpush.bf16.msrb.mxu2 %v2012_v0 }
 0x59e   :  { %v1362_v10 = vsub.f32 1.5, %v1361_v21  ;;  %v1058_v40 = vpop.f32.mrf.mxu0 }
 0x59f   :  { %v2115_v38 = vpop.eup %2114  ;;  %v3232_v26 = vadd.f32 1e-05, %v1204_v33  ;;  %v3234_v50 = vmul.f32 0.015625, %v1058_v40  ;;  %v3236_v23 = vpack.c.bf16 %v1425_v49, %v1424_v42 }
 0x5a0   :  { %v1369_v37 = vmul.f32 %v2115_v38, %v3208_v2  ;;  %v1363_v58 = vmul.f32 %v3204_v53, %v1362_v10  ;;  %v3251_v25 = vpop.eup %2116  ;;  %vm1375_vm8 = vweird.f32 %v2115_v38 }
 0x5a1   :  { %2118 = vrsqrt.f32 %v3232_v26  ;;  %v1173_v36 = vmul.f32 %v3234_v50, %v3234_v50  ;;  %v1249_v11 = vmul.f32 %v3251_v25, %v3223_v3  ;;  %vm1376_vm10 = vmor %vm1374_vm9, %vm1375_vm8  ;;  %1514 = vmatpush.bf16.msrb.mxu2 %v2011_v29  ;;  %vm1384_vm12 = vweird.f32 %v3232_v26 }
 0x5a2   :  { %v1370_v34 = vmul.f32 %v2115_v38, %v1369_v37  ;;  %v1367_v61 = vsel %vm3253_vm7, %v3204_v53, %v1363_v58  ;;  %vm1255_vm15 = vweird.f32 %v3251_v25  ;;  %v1220_v37 = vsub.f32 %v2985_v55, %v3210_v1 }
 0x5a3   :  { %v1189_v47 = vsub.f32 %v1157_v16, %v1173_v36  ;;  %v1410_v5 = vmul.f32 %v1367_v61, %v1218_v44  ;;  %v1250_v2 = vmul.f32 %v3251_v25, %v1249_v11  ;;  %vm1256_vm3 = vmor %vm1254_vm2, %vm1255_vm15  ;;  %v1207_v55 = vsub.f32 %v2929_v48, %v3177_v7 }
 0x5a4   :  { %v1371_v31 = vmul.f32 0.5, %v1370_v34 }
 0x5a5   :  { %v1205_v20 = vmax.f32 %v1189_v47, 0.0  ;;  %v1426_v22 = vmax.f32 %v1410_v5, 0.0  ;;  %v1251_v52 = vmul.f32 0.5, %v1250_v2 }
 0x5a6   :  { %v1372_v35 = vsub.f32 1.5, %v1371_v31  ;;  %v1094_v24 = vpop.f32.mrf.mxu0 }
 0x5a7   :  { %v2119_v28 = vpop.eup %2118  ;;  %v1237_v39 = vadd.f32 1e-05, %v1205_v20  ;;  %v1142_v19 = vmul.f32 0.015625, %v1094_v24  ;;  %v1252_v33 = vsub.f32 1.5, %v1251_v52 }
 0x5a8   :  { %v1373_v4 = vmul.f32 %v2115_v38, %v1372_v35  ;;  %v1379_v53 = vmul.f32 %v2119_v28, %v3232_v26  ;;  %vm1385_vm11 = vweird.f32 %v2119_v28  ;;  %v1221_v26 = vsub.f32 %v2988_v56, %v3234_v50 }
 0x5a9   :  { %2120 = vrsqrt.f32 %v1237_v39  ;;  %v1174_v13 = vsub.f32 %v1142_v19, %v1158_v14  ;;  %vm1386_vm13 = vmor %vm1384_vm12, %vm1385_vm11  ;;  %v1253_v16 = vmul.f32 %v3251_v25, %v1252_v33  ;;  %vm1394_vm0 = vweird.f32 %v1237_v39 }
 0x5aa   :  { %v1377_v43 = vsel %vm1376_vm10, %v2115_v38, %v1373_v4  ;;  %v1380_v30 = vmul.f32 %v2119_v28, %v1379_v53  ;;  %v1206_v56 = vsub.f32 %v2926_v45, %v3248_v51  ;;  %v3298_v45 = vld [vmem:[%s3323_s4] ss:$0 sm:$0xff]  ;;  %s2216_s4 = smov [#allocation2]  }
 0x5ab   :  { %v1411_v60 = vmul.f32 %v1377_v43, %v1219_v8  ;;  %v1190_v12 = vmax.f32 %v1174_v13, 0.0  ;;  %v1257_v32 = vsel %vm1256_vm3, %v3251_v25, %v1253_v16  ;;  %s1880_s8 = sshll.u32 %s2216_s4, 4  ;;  %s1881_s8 = int_to_ptr.vmem [resolvable:$true] %s1880_s8 }
 0x5ac   :  { %v1381_v18 = vmul.f32 0.5, %v1380_v30  ;;  %v1399_v50 = vmul.f32 %v1257_v32, %v1207_v55 }
 0x5ad   :  { %v1427_v62 = vmax.f32 %v1411_v60, 0.0  ;;  %v1222_v15 = vadd.f32 1e-05, %v1190_v12 }
 0x5ae   :  { %v1382_v17 = vsub.f32 1.5, %v1381_v18 }
 0x5af   :  { %v2121_v9 = vpop.eup %2120  ;;  %2122 = vrsqrt.f32 %v1222_v15  ;;  %v1436_v54 = vpack.c.bf16 %v1427_v62, %v1426_v22  ;;  %vm1244_vm5 = vweird.f32 %v1222_v15 }
 0x5b0   :  { %v1389_v21 = vmul.f32 %v2121_v9, %v1237_v39  ;;  %v1383_v42 = vmul.f32 %v2119_v28, %v1382_v17  ;;  %vm1395_vm14 = vweird.f32 %v2121_v9 }
 0x5b1   :  { %vm1396_vm1 = vmor %vm1394_vm0, %vm1395_vm14 }
 0x5b2   :  { %v1390_v49 = vmul.f32 %v2121_v9, %v1389_v21  ;;  %v1387_v46 = vsel %vm1386_vm13, %v2119_v28, %v1383_v42  ;;  %v1415_v28 = vmax.f32 %v1399_v50, 0.0 }
 0x5b3   :  { %v1412_v58 = vmul.f32 %v1387_v46, %v1220_v37 }
 0x5b4   :  { %v1391_v41 = vmul.f32 0.5, %v1390_v49 }
 0x5b5   :  { %v2123_v10 = vpop.eup %2122  ;;  %v1428_v1 = vmax.f32 %v1412_v58, 0.0 }
 0x5b6   :  { %v1392_v40 = vsub.f32 1.5, %v1391_v41  ;;  %v1239_v38 = vmul.f32 %v2123_v10, %v1222_v15  ;;  %vm1245_vm4 = vweird.f32 %v2123_v10 }
 0x5b7   :  { %vm1246_vm6 = vmor %vm1244_vm5, %vm1245_vm4 }
 0x5b8   :  { %v1393_v36 = vmul.f32 %v2121_v9, %v1392_v40  ;;  %v1240_v27 = vmul.f32 %v2123_v10, %v1239_v38 }
 0x5ba   :  { %v1397_v34 = vsel %vm1396_vm1, %v2121_v9, %v1393_v36  ;;  %v1241_v47 = vmul.f32 0.5, %v1240_v27 }
 0x5bb   :  { %v1413_v31 = vmul.f32 %v1397_v34, %v1221_v26 }
 0x5bc   :  { %v1242_v20 = vsub.f32 1.5, %v1241_v47 }
 0x5bd   :  { %v1429_v0 = vmax.f32 %v1413_v31, 0.0 }
 0x5be   :  { %v1243_v61 = vmul.f32 %v2123_v10, %v1242_v20 }
 0x5bf   :  { %v1437_v3 = vpack.c.bf16 %v1429_v0, %v1428_v1 }
 0x5c0   :  { %v1247_v35 = vsel %vm1246_vm6, %v2123_v10, %v1243_v61 }
 0x5c1   :  { %v1398_v24 = vmul.f32 %v1247_v35, %v1206_v56 }
 0x5c3   :  { %v1414_v14 = vmax.f32 %v1398_v24, 0.0 }
 0x5c5   :  { %v1430_v25 = vpack.c.bf16 %v1415_v28, %v1414_v14 }
 0x5c7   :  { %1515 = vmatmul.bf16.vlgmr.msrb.gmra.mxu2 %v1430_v25 }
 0x5d7   :  { %1520 = vmatmul.bf16.gmra.mxu2 %v3107_v59 }
 0x5e7   :  { %1525 = vmatmul.bf16.gmra.mxu2 %v3127_v63 }
 0x5f7   :  { %1530 = vmatmul.bf16.gmra.mxu2 %v3149_v6 }
 0x607   :  { %1535 = vmatmul.bf16.gmra.mxu2 %v3185_v57 }
 0x617   :  { %1540 = vmatmul.bf16.gmra.mxu2 %v3236_v23 }
 0x627   :  { %1545 = vmatmul.bf16.gmra.mxu2 %v1436_v54 }
 0x637   :  { %1550 = vmatmul.bf16.gmra.mxu2 %v1437_v3 }
 0x64a   :  { %v1516_v48 = vpop.f32.mrf.mxu2 }
 0x64b   :  { %v1517_v7 = vadd.f32 %v3298_v45, %v1516_v48 }
 0x64d   :  { %v1986_v51 = vmul.f32 -1.442695, %v1517_v7 }
 0x64f   :  { %2124 = vpow2.f32 %v1986_v51 }
 0x652   :  { %v1518_v59 = vpop.f32.mrf.mxu2 }
 0x653   :  { %v1519_v63 = vadd.f32 %v3298_v45, %v1518_v59 }
 0x655   :  { %v2125_v6 = vpop.eup %2124  ;;  %v1987_v44 = vmul.f32 -1.442695, %v1519_v63 }
 0x656   :  { %v1604_v57 = vadd.f32 1.0, %v2125_v6 }
 0x657   :  { %2126 = vpow2.f32 %v1987_v44 }
 0x658   :  { %2128 = vrcp.f32 %v1604_v57  ;;  %v1631_v13 = vand.u32 2147483648, %v1604_v57  ;;  %v1629_v30 = vand.u32 2147483647, %v1604_v57  ;;  %vm1625_vm8 = vweird.f32 %v1604_v57 }
 0x65a   :  { %v1521_v23 = vpop.f32.mrf.mxu2  ;;  %v1632_v62 = vor.u32 1.1754944e-38, %v1631_v13  ;;  %vm1630_vm10 = vcmp.eq.f32.partialorder %v1629_v30, 8.507059e+37 }
 0x65b   :  { %v1522_v39 = vadd.f32 %v3298_v45, %v1521_v23 }
 0x65d   :  { %v2127_v19 = vpop.eup %2126  ;;  %v1988_v11 = vmul.f32 -1.442695, %v1522_v39 }
 0x65e   :  { %v2129_v4 = vpop.eup %2128  ;;  %v1605_v53 = vadd.f32 1.0, %v2127_v19 }
 0x65f   :  { %v1621_v5 = vmul.f32 %v2129_v4, %v1604_v57  ;;  %2130 = vpow2.f32 %v1988_v11  ;;  %vm1626_vm7 = vweird.f32 %v2129_v4 }
 0x660   :  { %2132 = vrcp.f32 %v1605_v53  ;;  %vm1627_vm9 = vmor %vm1625_vm8, %vm1626_vm7  ;;  %v1646_v21 = vand.u32 2147483648, %v1605_v53  ;;  %v1644_v33 = vand.u32 2147483647, %v1605_v53  ;;  %vm1640_vm12 = vweird.f32 %v1605_v53 }
 0x661   :  { %v1622_v8 = vsub.f32 1.0, %v1621_v5 }
 0x662   :  { %v1523_v29 = vpop.f32.mrf.mxu2  ;;  %v1647_v37 = vor.u32 1.1754944e-38, %v1646_v21  ;;  %vm1645_vm14 = vcmp.eq.f32.partialorder %v1644_v33, 8.507059e+37 }
 0x663   :  { %v1623_v43 = vmul.f32 %v2129_v4, %v1622_v8  ;;  %v1524_v60 = vadd.f32 %v3298_v45, %v1523_v29 }
 0x665   :  { %v2131_v12 = vpop.eup %2130  ;;  %v1624_v2 = vadd.f32 %v2129_v4, %v1623_v43  ;;  %v1989_v18 = vmul.f32 -1.442695, %v1524_v60 }
 0x666   :  { %v2133_v22 = vpop.eup %2132  ;;  %v1606_v15 = vadd.f32 1.0, %v2131_v12 }
 0x667   :  { %v1628_v17 = vsel %vm1627_vm9, %v2129_v4, %v1624_v2  ;;  %v1636_v9 = vmul.f32 %v2133_v22, %v1605_v53  ;;  %2134 = vpow2.f32 %v1989_v18  ;;  %vm1641_vm11 = vweird.f32 %v2133_v22 }
 0x668   :  { %v1633_v54 = vsel %vm1630_vm10, %v1632_v62, %v1628_v17  ;;  %2136 = vrcp.f32 %v1606_v15  ;;  %vm1642_vm13 = vmor %vm1640_vm12, %vm1641_vm11  ;;  %v1661_v34 = vand.u32 2147483648, %v1606_v15  ;;  %v1659_v32 = vand.u32 2147483647, %v1606_v15 }
 0x669   :  { %1860 = vst [vmem:[#allocation2] sm:$0xff] %v1633_v54  ;;  %v1637_v52 = vsub.f32 1.0, %v1636_v9  ;;  %vm1655_vm0 = vweird.f32 %v1606_v15 }
 0x66a   :  { %v1526_v42 = vpop.f32.mrf.mxu2  ;;  %v1662_v56 = vor.u32 1.1754944e-38, %v1661_v34  ;;  %vm1660_vm2 = vcmp.eq.f32.partialorder %v1659_v32, 8.507059e+37 }
 0x66b   :  { %v1638_v49 = vmul.f32 %v2133_v22, %v1637_v52  ;;  %v1527_v41 = vadd.f32 %v3298_v45, %v1526_v42 }
 0x66d   :  { %v2135_v10 = vpop.eup %2134  ;;  %v1639_v46 = vadd.f32 %v2133_v22, %v1638_v49  ;;  %v1990_v40 = vmul.f32 -1.442695, %v1527_v41 }
 0x66e   :  { %v2137_v38 = vpop.eup %2136  ;;  %v1607_v16 = vadd.f32 1.0, %v2135_v10 }
 0x66f   :  { %v1643_v36 = vsel %vm1642_vm13, %v2133_v22, %v1639_v46  ;;  %v1651_v27 = vmul.f32 %v2137_v38, %v1606_v15  ;;  %2138 = vpow2.f32 %v1990_v40  ;;  %vm1656_vm15 = vweird.f32 %v2137_v38 }
 0x670   :  { %v1648_v58 = vsel %vm1645_vm14, %v1647_v37, %v1643_v36  ;;  %2140 = vrcp.f32 %v1607_v16  ;;  %vm1657_vm1 = vmor %vm1655_vm0, %vm1656_vm15  ;;  %v1676_v14 = vand.u32 2147483648, %v1607_v16  ;;  %v1674_v7 = vand.u32 2147483647, %v1607_v16 }
 0x671   :  { %1861 = vst [vmem:[#allocation2 + $0x8] sm:$0xff] %v1648_v58  ;;  %v1652_v26 = vsub.f32 1.0, %v1651_v27  ;;  %vm1670_vm4 = vweird.f32 %v1607_v16 }
 0x672   :  { %v1528_v47 = vpop.f32.mrf.mxu2  ;;  %v1677_v57 = vor.u32 1.1754944e-38, %v1676_v14  ;;  %vm1675_vm6 = vcmp.eq.f32.partialorder %v1674_v7, 8.507059e+37 }
 0x673   :  { %v1653_v31 = vmul.f32 %v2137_v38, %v1652_v26  ;;  %v1529_v20 = vadd.f32 %v3298_v45, %v1528_v47 }
 0x675   :  { %v2139_v55 = vpop.eup %2138  ;;  %v1654_v1 = vadd.f32 %v2137_v38, %v1653_v31  ;;  %v1991_v0 = vmul.f32 -1.442695, %v1529_v20 }
 0x676   :  { %v2141_v61 = vpop.eup %2140  ;;  %v1608_v50 = vadd.f32 1.0, %v2139_v55 }
 0x677   :  { %v1658_v3 = vsel %vm1657_vm1, %v2137_v38, %v1654_v1  ;;  %v1666_v35 = vmul.f32 %v2141_v61, %v1607_v16  ;;  %2142 = vpow2.f32 %v1991_v0  ;;  %vm1671_vm3 = vweird.f32 %v2141_v61 }
 0x678   :  { %v1663_v24 = vsel %vm1660_vm2, %v1662_v56, %v1658_v3  ;;  %2144 = vrcp.f32 %v1608_v50  ;;  %vm1672_vm5 = vmor %vm1670_vm4, %vm1671_vm3  ;;  %v1691_v53 = vand.u32 2147483648, %v1608_v50  ;;  %v1689_v13 = vand.u32 2147483647, %v1608_v50 }
 0x679   :  { %1862 = vst [vmem:[#allocation2 + $0x10] sm:$0xff] %v1663_v24  ;;  %v1667_v28 = vsub.f32 1.0, %v1666_v35  ;;  %vm1685_vm8 = vweird.f32 %v1608_v50 }
 0x67a   :  { %v1531_v25 = vpop.f32.mrf.mxu2  ;;  %v1692_v2 = vor.u32 1.1754944e-38, %v1691_v53  ;;  %vm1690_vm10 = vcmp.eq.f32.partialorder %v1689_v13, 8.507059e+37 }
 0x67b   :  { %v1668_v48 = vmul.f32 %v2141_v61, %v1667_v28  ;;  %v1532_v51 = vadd.f32 %v3298_v45, %v1531_v25 }
 0x67d   :  { %v2143_v59 = vpop.eup %2142  ;;  %v1669_v63 = vadd.f32 %v2141_v61, %v1668_v48  ;;  %v1992_v6 = vmul.f32 -1.442695, %v1532_v51 }
 0x67e   :  { %v2145_v44 = vpop.eup %2144  ;;  %v1609_v23 = vadd.f32 1.0, %v2143_v59 }
 0x67f   :  { %v1673_v39 = vsel %vm1672_vm5, %v2141_v61, %v1669_v63  ;;  %v1681_v19 = vmul.f32 %v2145_v44, %v1608_v50  ;;  %2146 = vpow2.f32 %v1992_v6  ;;  %vm1686_vm7 = vweird.f32 %v2145_v44 }
 0x680   :  { %v1678_v11 = vsel %vm1675_vm6, %v1677_v57, %v1673_v39  ;;  %2148 = vrcp.f32 %v1609_v23  ;;  %vm1687_vm9 = vmor %vm1685_vm8, %vm1686_vm7  ;;  %v1706_v9 = vand.u32 2147483648, %v1609_v23  ;;  %v1704_v21 = vand.u32 2147483647, %v1609_v23 }
 0x681   :  { %1863 = vst [vmem:[#allocation2 + $0x18] sm:$0xff] %v1678_v11  ;;  %v1682_v4 = vsub.f32 1.0, %v1681_v19  ;;  %vm1700_vm12 = vweird.f32 %v1609_v23 }
 0x682   :  { %v1533_v5 = vpop.f32.mrf.mxu2  ;;  %v1707_v46 = vor.u32 1.1754944e-38, %v1706_v9  ;;  %vm1705_vm14 = vcmp.eq.f32.partialorder %v1704_v21, 8.507059e+37 }
 0x683   :  { %v1683_v8 = vmul.f32 %v2145_v44, %v1682_v4  ;;  %v1534_v29 = vadd.f32 %v3298_v45, %v1533_v5 }
 0x685   :  { %v2147_v43 = vpop.eup %2146  ;;  %v1684_v30 = vadd.f32 %v2145_v44, %v1683_v8  ;;  %v1993_v60 = vmul.f32 -1.442695, %v1534_v29 }
 0x686   :  { %v2149_v12 = vpop.eup %2148  ;;  %v1610_v18 = vadd.f32 1.0, %v2147_v43 }
 0x687   :  { %v1688_v22 = vsel %vm1687_vm9, %v2145_v44, %v1684_v30  ;;  %v1696_v62 = vmul.f32 %v2149_v12, %v1609_v23  ;;  %2150 = vpow2.f32 %v1993_v60  ;;  %vm1701_vm11 = vweird.f32 %v2149_v12 }
 0x688   :  { %v1693_v15 = vsel %vm1690_vm10, %v1692_v2, %v1688_v22  ;;  %2152 = vrcp.f32 %v1610_v18  ;;  %vm1702_vm13 = vmor %vm1700_vm12, %vm1701_vm11  ;;  %v1721_v27 = vand.u32 2147483648, %v1610_v18  ;;  %v1719_v34 = vand.u32 2147483647, %v1610_v18 }
 0x689   :  { %1864 = vst [vmem:[#allocation2 + $0x20] sm:$0xff] %v1693_v15  ;;  %v1697_v17 = vsub.f32 1.0, %v1696_v62  ;;  %vm1715_vm0 = vweird.f32 %v1610_v18 }
 0x68a   :  { %v1536_v54 = vpop.f32.mrf.mxu2  ;;  %v1722_v1 = vor.u32 1.1754944e-38, %v1721_v27  ;;  %vm1720_vm2 = vcmp.eq.f32.partialorder %v1719_v34, 8.507059e+37 }
 0x68b   :  { %v1698_v52 = vmul.f32 %v2149_v12, %v1697_v17  ;;  %v1537_v42 = vadd.f32 %v3298_v45, %v1536_v54 }
 0x68d   :  { %v2151_v49 = vpop.eup %2150  ;;  %v1699_v33 = vadd.f32 %v2149_v12, %v1698_v52  ;;  %v1994_v41 = vmul.f32 -1.442695, %v1537_v42 }
 0x68e   :  { %v2153_v10 = vpop.eup %2152  ;;  %v1611_v40 = vadd.f32 1.0, %v2151_v49 }
 0x68f   :  { %v1703_v38 = vsel %vm1702_vm13, %v2149_v12, %v1699_v33  ;;  %v1711_v37 = vmul.f32 %v2153_v10, %v1610_v18  ;;  %2154 = vpow2.f32 %v1994_v41  ;;  %vm1716_vm15 = vweird.f32 %v2153_v10 }
 0x690   :  { %v1708_v16 = vsel %vm1705_vm14, %v1707_v46, %v1703_v38  ;;  %2156 = vrcp.f32 %v1611_v40  ;;  %vm1717_vm1 = vmor %vm1715_vm0, %vm1716_vm15  ;;  %v1736_v35 = vand.u32 2147483648, %v1611_v40  ;;  %v1734_v14 = vand.u32 2147483647, %v1611_v40 }
 0x691   :  { %1865 = vst [vmem:[#allocation2 + $0x28] sm:$0xff] %v1708_v16  ;;  %v1712_v36 = vsub.f32 1.0, %v1711_v37  ;;  %vm1730_vm4 = vweird.f32 %v1611_v40 }
 0x692   :  { %v1538_v58 = vpop.f32.mrf.mxu2  ;;  %v1737_v63 = vor.u32 1.1754944e-38, %v1736_v35  ;;  %vm1735_vm6 = vcmp.eq.f32.partialorder %v1734_v14, 8.507059e+37 }
 0x693   :  { %v1713_v26 = vmul.f32 %v2153_v10, %v1712_v36  ;;  %v1539_v47 = vadd.f32 %v3298_v45, %v1538_v58 }
 0x695   :  { %v2155_v31 = vpop.eup %2154  ;;  %v1714_v32 = vadd.f32 %v2153_v10, %v1713_v26  ;;  %v1995_v20 = vmul.f32 -1.442695, %v1539_v47 }
 0x696   :  { %v2157_v55 = vpop.eup %2156  ;;  %v1612_v0 = vadd.f32 1.0, %v2155_v31 }
 0x697   :  { %v1718_v61 = vsel %vm1717_vm1, %v2153_v10, %v1714_v32  ;;  %v1726_v56 = vmul.f32 %v2157_v55, %v1611_v40  ;;  %2158 = vpow2.f32 %v1995_v20  ;;  %vm1731_vm3 = vweird.f32 %v2157_v55 }
 0x698   :  { %v1723_v50 = vsel %vm1720_vm2, %v1722_v1, %v1718_v61  ;;  %2160 = vrcp.f32 %v1612_v0  ;;  %vm1732_vm5 = vmor %vm1730_vm4, %vm1731_vm3  ;;  %v1751_v19 = vand.u32 2147483648, %v1612_v0  ;;  %v1749_v53 = vand.u32 2147483647, %v1612_v0 }
 0x699   :  { %1866 = vst [vmem:[#allocation2 + $0x30] sm:$0xff] %v1723_v50  ;;  %v1727_v3 = vsub.f32 1.0, %v1726_v56  ;;  %vm1745_vm8 = vweird.f32 %v1612_v0 }
 0x69a   :  { %v1541_v24 = vpop.f32.mrf.mxu2  ;;  %v1752_v30 = vor.u32 1.1754944e-38, %v1751_v19  ;;  %vm1750_vm10 = vcmp.eq.f32.partialorder %v1749_v53, 8.507059e+37 }
 0x69b   :  { %v1728_v28 = vmul.f32 %v2157_v55, %v1727_v3  ;;  %v1542_v25 = vadd.f32 %v3298_v45, %v1541_v24 }
 0x69d   :  { %v2159_v48 = vpop.eup %2158  ;;  %v1729_v7 = vadd.f32 %v2157_v55, %v1728_v28  ;;  %v1996_v51 = vmul.f32 -1.442695, %v1542_v25 }
 0x69e   :  { %v2161_v59 = vpop.eup %2160  ;;  %v1613_v6 = vadd.f32 1.0, %v2159_v48 }
 0x69f   :  { %v1733_v44 = vsel %vm1732_vm5, %v2157_v55, %v1729_v7  ;;  %v1741_v57 = vmul.f32 %v2161_v59, %v1612_v0  ;;  %2162 = vpow2.f32 %v1996_v51  ;;  %vm1746_vm7 = vweird.f32 %v2161_v59 }
 0x6a0   :  { %v1738_v23 = vsel %vm1735_vm6, %v1737_v63, %v1733_v44  ;;  %2164 = vrcp.f32 %v1613_v6  ;;  %vm1747_vm9 = vmor %vm1745_vm8, %vm1746_vm7  ;;  %v1766_v62 = vand.u32 2147483648, %v1613_v6  ;;  %v1764_v9 = vand.u32 2147483647, %v1613_v6 }
 0x6a1   :  { %1867 = vst [vmem:[#allocation2 + $0x38] sm:$0xff] %v1738_v23  ;;  %v1742_v39 = vsub.f32 1.0, %v1741_v57  ;;  %vm1760_vm12 = vweird.f32 %v1613_v6 }
 0x6a2   :  { %v1543_v11 = vpop.f32.mrf.mxu2  ;;  %v1767_v33 = vor.u32 1.1754944e-38, %v1766_v62  ;;  %vm1765_vm14 = vcmp.eq.f32.partialorder %v1764_v9, 8.507059e+37 }
 0x6a3   :  { %v1743_v4 = vmul.f32 %v2161_v59, %v1742_v39  ;;  %v1544_v5 = vadd.f32 %v3298_v45, %v1543_v11 }
 0x6a5   :  { %v2163_v8 = vpop.eup %2162  ;;  %v1744_v13 = vadd.f32 %v2161_v59, %v1743_v4  ;;  %v1997_v29 = vmul.f32 -1.442695, %v1544_v5 }
 0x6a6   :  { %v2165_v43 = vpop.eup %2164  ;;  %v1614_v60 = vadd.f32 1.0, %v2163_v8 }
 0x6a7   :  { %v1748_v12 = vsel %vm1747_vm9, %v2161_v59, %v1744_v13  ;;  %v1756_v2 = vmul.f32 %v2165_v43, %v1613_v6  ;;  %2166 = vpow2.f32 %v1997_v29  ;;  %vm1761_vm11 = vweird.f32 %v2165_v43 }
 0x6a8   :  { %v1753_v18 = vsel %vm1750_vm10, %v1752_v30, %v1748_v12  ;;  %2168 = vrcp.f32 %v1614_v60  ;;  %vm1762_vm13 = vmor %vm1760_vm12, %vm1761_vm11  ;;  %v1781_v37 = vand.u32 2147483648, %v1614_v60  ;;  %v1779_v27 = vand.u32 2147483647, %v1614_v60 }
 0x6a9   :  { %1868 = vst [vmem:[#allocation2 + $0x40] sm:$0xff] %v1753_v18  ;;  %v1757_v22 = vsub.f32 1.0, %v1756_v2  ;;  %vm1775_vm0 = vweird.f32 %v1614_v60 }
 0x6aa   :  { %v1546_v15 = vpop.f32.mrf.mxu2  ;;  %v1782_v32 = vor.u32 1.1754944e-38, %v1781_v37  ;;  %vm1780_vm2 = vcmp.eq.f32.partialorder %v1779_v27, 8.507059e+37 }
 0x6ab   :  { %v1758_v17 = vmul.f32 %v2165_v43, %v1757_v22  ;;  %v1547_v54 = vadd.f32 %v3298_v45, %v1546_v15 }
 0x6ad   :  { %v2167_v52 = vpop.eup %2166  ;;  %v1759_v21 = vadd.f32 %v2165_v43, %v1758_v17  ;;  %v1998_v42 = vmul.f32 -1.442695, %v1547_v54 }
 0x6ae   :  { %v2169_v49 = vpop.eup %2168  ;;  %v1615_v41 = vadd.f32 1.0, %v2167_v52 }
 0x6af   :  { %v1763_v10 = vsel %vm1762_vm13, %v2165_v43, %v1759_v21  ;;  %v1771_v46 = vmul.f32 %v2169_v49, %v1614_v60  ;;  %2170 = vpow2.f32 %v1998_v42  ;;  %vm1776_vm15 = vweird.f32 %v2169_v49 }
 0x6b0   :  { %v1768_v40 = vsel %vm1765_vm14, %v1767_v33, %v1763_v10  ;;  %2172 = vrcp.f32 %v1615_v41  ;;  %vm1777_vm1 = vmor %vm1775_vm0, %vm1776_vm15  ;;  %v1796_v56 = vand.u32 2147483648, %v1615_v41  ;;  %v1794_v35 = vand.u32 2147483647, %v1615_v41 }
 0x6b1   :  { %1869 = vst [vmem:[#allocation2 + $0x48] sm:$0xff] %v1768_v40  ;;  %v1772_v38 = vsub.f32 1.0, %v1771_v46  ;;  %vm1790_vm4 = vweird.f32 %v1615_v41 }
 0x6b2   :  { %v1548_v16 = vpop.f32.mrf.mxu2  ;;  %v1797_v7 = vor.u32 1.1754944e-38, %v1796_v56  ;;  %vm1795_vm6 = vcmp.eq.f32.partialorder %v1794_v35, 8.507059e+37 }
 0x6b3   :  { %v1773_v36 = vmul.f32 %v2169_v49, %v1772_v38  ;;  %v1549_v58 = vadd.f32 %v3298_v45, %v1548_v16 }
 0x6b5   :  { %v2171_v26 = vpop.eup %2170  ;;  %v1774_v34 = vadd.f32 %v2169_v49, %v1773_v36  ;;  %v1999_v47 = vmul.f32 -1.442695, %v1549_v58 }
 0x6b6   :  { %v2173_v31 = vpop.eup %2172  ;;  %v1616_v20 = vadd.f32 1.0, %v2171_v26 }
 0x6b7   :  { %v1778_v55 = vsel %vm1777_vm1, %v2169_v49, %v1774_v34  ;;  %v1786_v1 = vmul.f32 %v2173_v31, %v1615_v41  ;;  %2174 = vpow2.f32 %v1999_v47  ;;  %vm1791_vm3 = vweird.f32 %v2173_v31 }
 0x6b8   :  { %v1783_v0 = vsel %vm1780_vm2, %v1782_v32, %v1778_v55  ;;  %2176 = vrcp.f32 %v1616_v20  ;;  %vm1792_vm5 = vmor %vm1790_vm4, %vm1791_vm3  ;;  %v1811_v57 = vand.u32 2147483648, %v1616_v20  ;;  %v1809_v19 = vand.u32 2147483647, %v1616_v20 }
 0x6b9   :  { %1870 = vst [vmem:[#allocation2 + $0x50] sm:$0xff] %v1783_v0  ;;  %v1787_v61 = vsub.f32 1.0, %v1786_v1  ;;  %vm1805_vm8 = vweird.f32 %v1616_v20 }
 0x6ba   :  { %v1551_v50 = vpop.f32.mrf.mxu2  ;;  %v1812_v13 = vor.u32 1.1754944e-38, %v1811_v57  ;;  %vm1810_vm10 = vcmp.eq.f32.partialorder %v1809_v19, 8.507059e+37 }
 0x6bb   :  { %v1788_v3 = vmul.f32 %v2173_v31, %v1787_v61  ;;  %v1552_v24 = vadd.f32 %v3298_v45, %v1551_v50 }
 0x6bd   :  { %v2175_v28 = vpop.eup %2174  ;;  %v1789_v14 = vadd.f32 %v2173_v31, %v1788_v3  ;;  %v2000_v25 = vmul.f32 -1.442695, %v1552_v24 }
 0x6be   :  { %v2177_v48 = vpop.eup %2176  ;;  %v1617_v51 = vadd.f32 1.0, %v2175_v28 }
 0x6bf   :  { %v1793_v59 = vsel %vm1792_vm5, %v2173_v31, %v1789_v14  ;;  %v1801_v63 = vmul.f32 %v2177_v48, %v1616_v20  ;;  %2178 = vpow2.f32 %v2000_v25  ;;  %vm1806_vm7 = vweird.f32 %v2177_v48 }
 0x6c0   :  { %v1798_v6 = vsel %vm1795_vm6, %v1797_v7, %v1793_v59  ;;  %2180 = vrcp.f32 %v1617_v51  ;;  %vm1807_vm9 = vmor %vm1805_vm8, %vm1806_vm7  ;;  %v1826_v2 = vand.u32 2147483648, %v1617_v51  ;;  %vm1820_vm12 = vweird.f32 %v1617_v51 }
 0x6c1   :  { %1871 = vst [vmem:[#allocation2 + $0x58] sm:$0xff] %v1798_v6  ;;  %v1802_v44 = vsub.f32 1.0, %v1801_v63 }
 0x6c2   :  { %v1553_v23 = vpop.f32.mrf.mxu2  ;;  %v1827_v17 = vor.u32 1.1754944e-38, %v1826_v2 }
 0x6c3   :  { %v1803_v39 = vmul.f32 %v2177_v48, %v1802_v44  ;;  %v1554_v11 = vadd.f32 %v3298_v45, %v1553_v23  ;;  %v1824_v45 = vand.u32 2147483647, %v1617_v51 }
 0x6c5   :  { %v2179_v4 = vpop.eup %2178  ;;  %v1804_v53 = vadd.f32 %v2177_v48, %v1803_v39  ;;  %v2001_v5 = vmul.f32 -1.442695, %v1554_v11  ;;  %vm1825_vm14 = vcmp.eq.f32.partialorder %v1824_v45, 8.507059e+37 }
 0x6c6   :  { %v2181_v8 = vpop.eup %2180  ;;  %v1618_v29 = vadd.f32 1.0, %v2179_v4 }
 0x6c7   :  { %v1808_v43 = vsel %vm1807_vm9, %v2177_v48, %v1804_v53  ;;  %v1816_v30 = vmul.f32 %v2181_v8, %v1617_v51  ;;  %2182 = vpow2.f32 %v2001_v5  ;;  %vm1821_vm11 = vweird.f32 %v2181_v8 }
 0x6c8   :  { %v1813_v60 = vsel %vm1810_vm10, %v1812_v13, %v1808_v43  ;;  %2184 = vrcp.f32 %v1618_v29  ;;  %vm1822_vm13 = vmor %vm1820_vm12, %vm1821_vm11  ;;  %v1841_v49 = vand.u32 2147483648, %v1618_v29  ;;  %v1839_v41 = vand.u32 2147483647, %v1618_v29 }
 0x6c9   :  { %1872 = vst [vmem:[#allocation2 + $0x60] sm:$0xff] %v1813_v60  ;;  %v1817_v12 = vsub.f32 1.0, %v1816_v30  ;;  %vm1835_vm0 = vweird.f32 %v1618_v29 }
 0x6ca   :  { %v1842_v40 = vor.u32 1.1754944e-38, %v1841_v49  ;;  %vm1840_vm2 = vcmp.eq.f32.partialorder %v1839_v41, 8.507059e+37 }
 0x6cb   :  { %v1818_v18 = vmul.f32 %v2181_v8, %v1817_v12 }
 0x6cd   :  { %v2183_v22 = vpop.eup %2182  ;;  %v1819_v62 = vadd.f32 %v2181_v8, %v1818_v18 }
 0x6ce   :  { %v2185_v15 = vpop.eup %2184  ;;  %v1619_v9 = vadd.f32 1.0, %v2183_v22 }
 0x6cf   :  { %v1823_v54 = vsel %vm1822_vm13, %v2181_v8, %v1819_v62  ;;  %v1831_v52 = vmul.f32 %v2185_v15, %v1618_v29  ;;  %vm1836_vm15 = vweird.f32 %v2185_v15 }
 0x6d0   :  { %v1828_v21 = vsel %vm1825_vm14, %v1827_v17, %v1823_v54  ;;  %2186 = vrcp.f32 %v1619_v9  ;;  %vm1837_vm1 = vmor %vm1835_vm0, %vm1836_vm15  ;;  %v1856_v27 = vand.u32 2147483648, %v1619_v9  ;;  %v1854_v26 = vand.u32 2147483647, %v1619_v9 }
 0x6d1   :  { %1873 = vst [vmem:[#allocation2 + $0x68] sm:$0xff] %v1828_v21  ;;  %v1832_v42 = vsub.f32 1.0, %v1831_v52  ;;  %vm1850_vm4 = vweird.f32 %v1619_v9 }
 0x6d2   :  { %v1857_v47 = vor.u32 1.1754944e-38, %v1856_v27  ;;  %vm1855_vm6 = vcmp.eq.f32.partialorder %v1854_v26, 8.507059e+37 }
 0x6d3   :  { %v1833_v33 = vmul.f32 %v2185_v15, %v1832_v42 }
 0x6d5   :  { %v1834_v10 = vadd.f32 %v2185_v15, %v1833_v33 }
 0x6d6   :  { %v2187_v46 = vpop.eup %2186 }
 0x6d7   :  { %v1838_v38 = vsel %vm1837_vm1, %v2185_v15, %v1834_v10  ;;  %v1846_v37 = vmul.f32 %v2187_v46, %v1619_v9  ;;  %vm1851_vm3 = vweird.f32 %v2187_v46 }
 0x6d8   :  { %v1843_v16 = vsel %vm1840_vm2, %v1842_v40, %v1838_v38  ;;  %vm1852_vm5 = vmor %vm1850_vm4, %vm1851_vm3 }
 0x6d9   :  { %1874 = vst [vmem:[#allocation2 + $0x70] sm:$0xff] %v1843_v16  ;;  %v1847_v36 = vsub.f32 1.0, %v1846_v37 }
 0x6db   :  { %v1848_v58 = vmul.f32 %v2187_v46, %v1847_v36 }
 0x6dd   :  { %v1849_v34 = vadd.f32 %v2187_v46, %v1848_v58 }
 0x6df   :  { %v1853_v31 = vsel %vm1852_vm5, %v2187_v46, %v1849_v34 }
 0x6e0   :  { %v1858_v32 = vsel %vm1855_vm6, %v1857_v47, %v1853_v31 }
 0x6e1   :  { %1875 = vst [vmem:[#allocation2 + $0x78] sm:$0xff] %v1858_v32 }
 0x6e2   :  { %1888 = dma.vmem_to_hbm [thread:$0]  %s1881_s8, 2048, %s1883_s11, [#allocation3], %s2217_s12, %s2217_s12, %s2218_s13  }
 0x6e3   :  { %2213 = dma.done.wait [#allocation3], 2048  }
 0x6e4   :  { %2214 = vsyncadd [#allocation3], 4294965248 }
 0x6e5   :  { %1893 = vsyncpa [#allocation3], 1 }

</bundles_post_ra>
